<compile_context>
chip_gen: v6e
topology: v6e:2x2x1
jax: 0.10.0
libtpu: 0.0.40
codegen_flags: <defaults>
</compile_context>

<pallas_src>
from functools import partial

import jax
import jax.numpy as jnp
from jax.experimental import pallas as pl
from jax.experimental.pallas import tpu as pltpu


# ----------------------------- Pallas kernel ---------------------------------

def equivariant_kernel(rel_ref, col_ref, wqkv_ref, bqkv_ref, headmix_ref,
                       wout_ref, bout_ref, gamma_ref, beta_ref,
                       out_ref, sum_ref, cnt_ref,
                       *, num_heads, hidden_dim, node_block):
    H, D = num_heads, hidden_dim
    HD = H * D
    e_step = pl.program_id(1)
    e_last = pl.num_programs(1) - 1

    # Zero the per-node-block accumulators at the start of the edge loop.
    @pl.when(e_step == 0)
    def _init():
        sum_ref[...] = jnp.zeros_like(sum_ref)
        cnt_ref[...] = jnp.zeros_like(cnt_ref)

    rel = rel_ref[...]                                           # [TE, 3] f32

    # Fused q|k|v projection: one pass over rel (K=3 contraction stays on the VPU).
    w = wqkv_ref[...]                                            # [3, 3*HD]
    qkv = (rel[:, 0:1] * w[0:1, :]
           + rel[:, 1:2] * w[1:2, :]
           + rel[:, 2:3] * w[2:3, :]
           + bqkv_ref[...])                                      # [TE, 3*HD]
    q = qkv[:, 0:HD]                                             # 128-lane aligned slices
    k = qkv[:, HD:2 * HD]
    v = qkv[:, 2 * HD:3 * HD]

    # Head scores via one lane-aligned block-diagonal matmul:
    #   headmix[h*D+i, h*D+j] = 1  =>  scores_full[:, h*D+j] = sum_i (q*k)[:, h*D+i]
    # i.e. each head's score is broadcast across its D lanes (kept f32 for v5e).
    scores_full = jnp.dot(q * k, headmix_ref[...],
                          preferred_element_type=jnp.float32) * (1.0 / (D ** 0.5))
    m = jnp.max(scores_full, axis=-1, keepdims=True)             # = max over heads
    p = jnp.exp(scores_full - m)                                 # [TE, HD]
    denom = jnp.sum(p, axis=-1, keepdims=True) * (1.0 / D)       # = sum over heads
    attn_full = p / denom                                        # per-head attn, broadcast over D lanes
    # TODO(synk): nn.Dropout(p=0.5) is identity in eval mode; training-mode RNG masking not implemented.

    weighted = attn_full * v                                     # [TE, HD] f32

    # Scatter-add of this edge tile onto the node block via a one-hot bf16 MXU matmul
    # (f32 accumulation); the mean scaling happens after the grid, in f32.
    col = col_ref[...]                                           # [1, TE] int32 (-1 = padding)
    first_node = pl.program_id(0) * node_block
    node_ids = first_node + jax.lax.broadcasted_iota(jnp.int32, (node_block, 1), 0)
    mask = (node_ids == col).astype(jnp.bfloat16)                # [NB, TE] one-hot (exact in bf16)
    sum_ref[...] += jnp.dot(mask, weighted.astype(jnp.bfloat16),
                            preferred_element_type=jnp.float32)  # [NB, HD] f32
    cnt_ref[...] += jnp.sum(mask.astype(jnp.float32), axis=-1, keepdims=True)

    # Finalize only once per node block: mean, linear_out, LayerNorm, SiLU.
    @pl.when(e_step == e_last)
    def _finalize():
        inv = 1.0 / jnp.maximum(cnt_ref[...], 1.0)               # empty nodes -> 0 rows
        updated = sum_ref[...] * inv                             # [NB, HD] f32
        out = jnp.dot(updated, wout_ref[...],
                      preferred_element_type=jnp.float32) + bout_ref[...]  # [NB, Dh]
        mean = jnp.mean(out, axis=-1, keepdims=True)
        var = jnp.mean((out - mean) ** 2, axis=-1, keepdims=True)
        normed = (out - mean) * jax.lax.rsqrt(var + 1e-5)
        normed = normed * gamma_ref[...] + beta_ref[...]
        out_ref[...] = normed * jax.nn.sigmoid(normed)


# ------------------------------- wrapper --------------------------------------

def equivariant_layer(positions, edge_index, params, *, num_heads, hidden_dim,
                      edge_tile=512, node_block=None):
    N = positions.shape[0]
    HD = num_heads * hidden_dim

    row, col = edge_index[0], edge_index[1]
    rel = (positions[row] - positions[col]).astype(jnp.float32)  # glue: dynamic gather
    E = rel.shape[0]

    # Edge tiling: TE multiple of 128 (col lane dim); pad edges, sentinel col = -1.
    TE = max(128, ((int(edge_tile) + 127) // 128) * 128)
    E_pad = ((E + TE - 1) // TE) * TE
    rel = jnp.pad(rel, ((0, E_pad - E), (0, 0)))
    col_p = jnp.pad(col.astype(jnp.int32), (0, E_pad - E), constant_values=-1)
    col_2d = col_p.reshape(1, E_pad)

    # Node blocking (parallel axis; multiple of 8 for sublane alignment).
    NB = N if node_block is None else int(node_block)
    NB = ((max(NB, 1) + 7) // 8) * 8
    N_pad = ((N + NB - 1) // NB) * NB
    num_nblocks = N_pad // NB
    num_etiles = E_pad // TE

    # Fused q|k|v weights and the block-diagonal head-mixing matrix (constants).
    wqkv = jnp.concatenate([params["wq"], params["wk"], params["wv"]], axis=1)  # [3, 3*HD]
    bqkv = jnp.concatenate([params["bq"], params["bk"], params["bv"]], axis=1)  # [1, 3*HD]
    headmix = jnp.kron(jnp.eye(num_heads, dtype=jnp.float32),
                       jnp.ones((hidden_dim, hidden_dim), jnp.float32))         # [HD, HD]

    kernel = partial(equivariant_kernel, num_heads=num_heads,
                     hidden_dim=hidden_dim, node_block=NB)

    grid_spec = pltpu.PrefetchScalarGridSpec(
        num_scalar_prefetch=0,
        grid=(num_nblocks, num_etiles),
        in_specs=[
            pl.BlockSpec((TE, 3), lambda n, e: (e, 0)),             # rel tile
            pl.BlockSpec((1, TE), lambda n, e: (0, e)),             # col tile
            pl.BlockSpec((3, 3 * HD), lambda n, e: (0, 0)),         # wqkv (resident)
            pl.BlockSpec((1, 3 * HD), lambda n, e: (0, 0)),         # bqkv
            pl.BlockSpec((HD, HD), lambda n, e: (0, 0)),            # headmix
            pl.BlockSpec((HD, hidden_dim), lambda n, e: (0, 0)),    # wout
            pl.BlockSpec((1, hidden_dim), lambda n, e: (0, 0)),     # bout
            pl.BlockSpec((1, hidden_dim), lambda n, e: (0, 0)),     # gamma
            pl.BlockSpec((1, hidden_dim), lambda n, e: (0, 0)),     # beta
        ],
        out_specs=pl.BlockSpec((NB, hidden_dim), lambda n, e: (n, 0)),
        scratch_shapes=[pltpu.VMEM((NB, HD), jnp.float32),          # scatter sum accumulator
                        pltpu.VMEM((NB, 1), jnp.float32)],          # per-node edge counts
    )

    out = pl.pallas_call(
        kernel,
        out_shape=jax.ShapeDtypeStruct((N_pad, hidden_dim), jnp.float32),
        grid_spec=grid_spec,
        compiler_params=pltpu.CompilerParams(
            dimension_semantics=("parallel", "arbitrary"),
            # explicit scoped-VMEM budget: above the 16/32 MiB defaults, with
            # headroom under v7x's 64 MiB physical VMEM.
            vmem_limit_bytes=48 * 1024 * 1024),
    )(rel, col_2d, wqkv, bqkv, headmix,
      params["wout"], params["bout"], params["gamma"], params["beta"])

    return out[:N]


# --------------------------- parameter init ------------------------------------

def init_params(key, hidden_dim, num_heads):
    HD = hidden_dim * num_heads

    def xavier(k, fan_in, fan_out):
        limit = (6.0 / (fan_in + fan_out)) ** 0.5
        # torch stores weight as [out, in]; we store transposed ([in, out]) for x @ W.
        return jax.random.uniform(k, (fan_in, fan_out), jnp.float32, -limit, limit)

    def bias(k, fan_in, n):
        limit = 1.0 / (fan_in ** 0.5)
        return jax.random.uniform(k, (1, n), jnp.float32, -limit, limit)

    ks = jax.random.split(key, 8)
    return {
        "wq": xavier(ks[0], 3, HD),            "bq": bias(ks[1], 3, HD),
        "wk": xavier(ks[2], 3, HD),            "bk": bias(ks[3], 3, HD),
        "wv": xavier(ks[4], 3, HD),            "bv": bias(ks[5], 3, HD),
        "wout": xavier(ks[6], HD, hidden_dim), "bout": bias(ks[7], HD, hidden_dim),
        "gamma": jnp.ones((1, hidden_dim), jnp.float32),
        "beta": jnp.zeros((1, hidden_dim), jnp.float32),
    }


# ------------------------ pure-JAX reference (check) ---------------------------

def reference(positions, edge_index, params, *, num_heads, hidden_dim):
    row, col = edge_index[0], edge_index[1]
    rel = positions[row] - positions[col]
    E, N = rel.shape[0], positions.shape[0]
    q = rel @ params["wq"] + params["bq"][0]
    k = rel @ params["wk"] + params["bk"][0]
    v = rel @ params["wv"] + params["bv"][0]
    qh = q.reshape(E, num_heads, hidden_dim)
    kh = k.reshape(E, num_heads, hidden_dim)
    vh = v.reshape(E, num_heads, hidden_dim)
    scores = (qh * kh).sum(-1) / (hidden_dim ** 0.5)
    attn = jax.nn.softmax(scores, axis=-1)
    wv = (attn[..., None] * vh).reshape(E, -1)
    sums = jax.ops.segment_sum(wv, col, num_segments=N)
    counts = jax.ops.segment_sum(jnp.ones((E,), jnp.float32), col, num_segments=N)
    updated = sums / jnp.maximum(counts, 1.0)[:, None]
    out = updated @ params["wout"] + params["bout"][0]
    mean = out.mean(-1, keepdims=True)
    var = ((out - mean) ** 2).mean(-1, keepdims=True)
    normed = (out - mean) / jnp.sqrt(var + 1e-5) * params["gamma"][0] + params["beta"][0]
    return normed * jax.nn.sigmoid(normed)


# --------------------------------- main ----------------------------------------

if __name__ == "__main__":
    hidden_dim = 32
    num_heads = 4
    cutoff_distance = 5.0   # stored in the torch module but unused in forward
    N, E = 16, 300          # small, but enough to exercise 2 node blocks x 3 edge tiles

    key = jax.random.PRNGKey(0)
    k_pos, k_row, k_col, k_par = jax.random.split(key, 4)

    positions = jax.random.normal(k_pos, (N, 3), jnp.float32)
    row = jax.random.randint(k_row, (E,), 0, N, jnp.int32)
    col = jax.random.randint(k_col, (E,), 0, N, jnp.int32)
    edge_index = jnp.stack([row, col], axis=0)            # [2, E]

    params = init_params(k_par, hidden_dim, num_heads)

    out = equivariant_layer(positions, edge_index, params,
                            num_heads=num_heads, hidden_dim=hidden_dim,
                            edge_tile=128, node_block=8)
    out = jax.block_until_ready(out)

    ref = reference(positions, edge_index, params,
                    num_heads=num_heads, hidden_dim=hidden_dim)
    assert out.shape == (N, hidden_dim)
    # Tolerance reflects the bf16 MXU operands used for the scatter matmul
    # (one-hot mask exact in bf16, weighted values truncated to bf16; accumulation
    # and mean scaling stay f32). Everything else is f32.
    err = float(jnp.max(jnp.abs(out - ref)))
    assert jnp.allclose(out, ref, atol=2e-2, rtol=2e-2), f"mismatch: max abs err {err}"

    print("KERNEL_OK")
</pallas_src>

<mosaic_0001>
module attributes {stable_mosaic.version = 11 : i64} {
  func.func @equivariant_kernel(%arg0: i32, %arg1: i32, %arg2: memref<128x3xf32, #tpu.memory_space<vmem>>, %arg3: memref<1x128xi32, #tpu.memory_space<vmem>>, %arg4: memref<3x384xf32, #tpu.memory_space<vmem>>, %arg5: memref<1x384xf32, #tpu.memory_space<vmem>>, %arg6: memref<128x128xf32, #tpu.memory_space<vmem>>, %arg7: memref<128x32xf32, #tpu.memory_space<vmem>>, %arg8: memref<1x32xf32, #tpu.memory_space<vmem>>, %arg9: memref<1x32xf32, #tpu.memory_space<vmem>>, %arg10: memref<1x32xf32, #tpu.memory_space<vmem>>, %arg11: memref<8x32xf32, #tpu.memory_space<vmem>>, %arg12: memref<8x128xf32, #tpu.memory_space<vmem>>, %arg13: memref<8x1xf32, #tpu.memory_space<vmem>>) attributes {dimension_semantics = [#tpu.dimension_semantics<parallel>, #tpu.dimension_semantics<arbitrary>], iteration_bounds = array<i64: 2, 3>, scalar_prefetch = 0 : i64, scratch_operands = 2 : i64, tpu.core_type = #tpu.core_type<tc>, window_params = [{transform_indices = @transform_0, window_bounds = array<i64: 128, 3>}, {transform_indices = @transform_1, window_bounds = array<i64: 1, 128>}, {pipeline_mode = #tpu.pipeline_mode<synchronous>, transform_indices = @transform_2, window_bounds = array<i64: 3, 384>}, {pipeline_mode = #tpu.pipeline_mode<synchronous>, transform_indices = @transform_3, window_bounds = array<i64: 1, 384>}, {pipeline_mode = #tpu.pipeline_mode<synchronous>, transform_indices = @transform_4, window_bounds = array<i64: 128, 128>}, {pipeline_mode = #tpu.pipeline_mode<synchronous>, transform_indices = @transform_5, window_bounds = array<i64: 128, 32>}, {pipeline_mode = #tpu.pipeline_mode<synchronous>, transform_indices = @transform_6, window_bounds = array<i64: 1, 32>}, {pipeline_mode = #tpu.pipeline_mode<synchronous>, transform_indices = @transform_7, window_bounds = array<i64: 1, 32>}, {pipeline_mode = #tpu.pipeline_mode<synchronous>, transform_indices = @transform_8, window_bounds = array<i64: 1, 32>}, {transform_indices = @transform_9, window_bounds = array<i64: 8, 32>}]} {
    %c0_i32 = arith.constant 0 : i32
    %0 = arith.cmpi eq, %arg1, %c0_i32 : i32
    %1 = arith.extui %0 : i1 to i32
    %c0_i32_0 = arith.constant 0 : i32
    %2 = arith.cmpi ne, %1, %c0_i32_0 : i32
    scf.if %2 {
      %cst_25 = arith.constant 0.000000e+00 : f32
      %70 = vector.broadcast %cst_25 : f32 to vector<8x128xf32>
      %c0_26 = arith.constant 0 : index
      %c0_27 = arith.constant 0 : index
      %71 = vector.load %arg12[%c0_26, %c0_27] : memref<8x128xf32, #tpu.memory_space<vmem>>, vector<8x128xf32>
      tpu.vector_store %arg12[%c0_26, %c0_27], %70 {strides = array<i32>} : memref<8x128xf32, #tpu.memory_space<vmem>>, vector<8x128xf32>,
      %cst_28 = arith.constant 0.000000e+00 : f32
      %72 = vector.broadcast %cst_28 : f32 to vector<8x1xf32>
      %c0_29 = arith.constant 0 : index
      %c0_30 = arith.constant 0 : index
      %73 = vector.load %arg13[%c0_29, %c0_30] : memref<8x1xf32, #tpu.memory_space<vmem>>, vector<8x1xf32>
      tpu.vector_store %arg13[%c0_29, %c0_30], %72 {strides = array<i32>} : memref<8x1xf32, #tpu.memory_space<vmem>>, vector<8x1xf32>,
    } else {
    }
    %c0 = arith.constant 0 : index
    %c0_1 = arith.constant 0 : index
    %3 = vector.load %arg2[%c0, %c0_1] : memref<128x3xf32, #tpu.memory_space<vmem>>, vector<128x3xf32>
    %c0_2 = arith.constant 0 : index
    %c0_3 = arith.constant 0 : index
    %4 = vector.load %arg4[%c0_2, %c0_3] : memref<3x384xf32, #tpu.memory_space<vmem>>, vector<3x384xf32>
    %5 = vector.extract_strided_slice %3 {offsets = [0, 0], sizes = [128, 1], strides = [1, 1]} : vector<128x3xf32> to vector<128x1xf32>
    %6 = vector.extract_strided_slice %4 {offsets = [0, 0], sizes = [1, 384], strides = [1, 1]} : vector<3x384xf32> to vector<1x384xf32>
    %7 = vector.broadcast %5 : vector<128x1xf32> to vector<128x384xf32>
    %8 = vector.broadcast %6 : vector<1x384xf32> to vector<128x384xf32>
    %9 = arith.mulf %7, %8 : vector<128x384xf32>
    %10 = vector.extract_strided_slice %3 {offsets = [0, 1], sizes = [128, 1], strides = [1, 1]} : vector<128x3xf32> to vector<128x1xf32>
    %11 = vector.extract_strided_slice %4 {offsets = [1, 0], sizes = [1, 384], strides = [1, 1]} : vector<3x384xf32> to vector<1x384xf32>
    %12 = vector.broadcast %10 : vector<128x1xf32> to vector<128x384xf32>
    %13 = vector.broadcast %11 : vector<1x384xf32> to vector<128x384xf32>
    %14 = arith.mulf %12, %13 : vector<128x384xf32>
    %15 = arith.addf %9, %14 : vector<128x384xf32>
    %16 = vector.extract_strided_slice %3 {offsets = [0, 2], sizes = [128, 1], strides = [1, 1]} : vector<128x3xf32> to vector<128x1xf32>
    %17 = vector.extract_strided_slice %4 {offsets = [2, 0], sizes = [1, 384], strides = [1, 1]} : vector<3x384xf32> to vector<1x384xf32>
    %18 = vector.broadcast %16 : vector<128x1xf32> to vector<128x384xf32>
    %19 = vector.broadcast %17 : vector<1x384xf32> to vector<128x384xf32>
    %20 = arith.mulf %18, %19 : vector<128x384xf32>
    %21 = arith.addf %15, %20 : vector<128x384xf32>
    %c0_4 = arith.constant 0 : index
    %c0_5 = arith.constant 0 : index
    %22 = vector.load %arg5[%c0_4, %c0_5] : memref<1x384xf32, #tpu.memory_space<vmem>>, vector<1x384xf32>
    %23 = vector.broadcast %22 : vector<1x384xf32> to vector<128x384xf32>
    %24 = arith.addf %21, %23 : vector<128x384xf32>
    %25 = vector.extract_strided_slice %24 {offsets = [0, 0], sizes = [128, 128], strides = [1, 1]} : vector<128x384xf32> to vector<128x128xf32>
    %26 = vector.extract_strided_slice %24 {offsets = [0, 128], sizes = [128, 128], strides = [1, 1]} : vector<128x384xf32> to vector<128x128xf32>
    %27 = vector.extract_strided_slice %24 {offsets = [0, 256], sizes = [128, 128], strides = [1, 1]} : vector<128x384xf32> to vector<128x128xf32>
    %28 = arith.mulf %25, %26 : vector<128x128xf32>
    %c0_6 = arith.constant 0 : index
    %c0_7 = arith.constant 0 : index
    %29 = vector.load %arg6[%c0_6, %c0_7] : memref<128x128xf32, #tpu.memory_space<vmem>>, vector<128x128xf32>
    %cst = arith.constant dense<0.000000e+00> : vector<128x128xf32>
    %30 = tpu.matmul %28, %29, %cst {dimension_numbers = #tpu.dot_dimension_numbers<[1], [0], [0], [1], [0, 0, 1, 1], [], []>} : vector<128x128xf32>, vector<128x128xf32>, vector<128x128xf32> -> vector<128x128xf32>
    %cst_8 = arith.constant 0.176776692 : f32
    %31 = vector.broadcast %cst_8 : f32 to vector<128x128xf32>
    %32 = arith.mulf %30, %31 : vector<128x128xf32>
    %cst_9 = arith.constant dense<0xFF800000> : vector<128xf32>
    %33 = vector.multi_reduction <maximumf>, %32, %cst_9 [1] : vector<128x128xf32> to vector<128xf32>
    %34 = vector.shape_cast %33 : vector<128xf32> to vector<128x1xf32>
    %35 = vector.broadcast %34 : vector<128x1xf32> to vector<128x128xf32>
    %36 = arith.subf %32, %35 : vector<128x128xf32>
    %37 = math.exp %36 : vector<128x128xf32>
    %cst_10 = arith.constant dense<0.000000e+00> : vector<128xf32>
    %38 = vector.multi_reduction <add>, %37, %cst_10 [1] : vector<128x128xf32> to vector<128xf32>
    %39 = vector.shape_cast %38 : vector<128xf32> to vector<128x1xf32>
    %cst_11 = arith.constant 3.125000e-02 : f32
    %40 = vector.broadcast %cst_11 : f32 to vector<128x1xf32>
    %41 = arith.mulf %39, %40 : vector<128x1xf32>
    %42 = vector.broadcast %41 : vector<128x1xf32> to vector<128x128xf32>
    %43 = arith.divf %37, %42 : vector<128x128xf32>
    %44 = arith.mulf %43, %27 : vector<128x128xf32>
    %c0_12 = arith.constant 0 : index
    %c0_13 = arith.constant 0 : index
    %45 = vector.load %arg3[%c0_12, %c0_13] : memref<1x128xi32, #tpu.memory_space<vmem>>, vector<1x128xi32>
    %c8_i32 = arith.constant 8 : i32
    %46 = arith.muli %arg0, %c8_i32 : i32
    %47 = tpu.iota {dimensions = array<i32: 0>} : vector<8x1xi32>
    %48 = vector.broadcast %46 : i32 to vector<8x1xi32>
    %49 = arith.addi %48, %47 : vector<8x1xi32>
    %50 = vector.broadcast %49 : vector<8x1xi32> to vector<8x128xi32>
    %51 = vector.broadcast %45 : vector<1x128xi32> to vector<8x128xi32>
    %52 = arith.cmpi eq, %50, %51 : vector<8x128xi32>
    %53 = arith.extui %52 : vector<8x128xi1> to vector<8x128xi32>
    %54 = arith.sitofp %53 : vector<8x128xi32> to vector<8x128xf32>
    %55 = arith.truncf %54 : vector<8x128xf32> to vector<8x128xbf16>
    %c0_14 = arith.constant 0 : index
    %c0_15 = arith.constant 0 : index
    %56 = vector.load %arg12[%c0_14, %c0_15] : memref<8x128xf32, #tpu.memory_space<vmem>>, vector<8x128xf32>
    %57 = arith.truncf %44 : vector<128x128xf32> to vector<128x128xbf16>
    %cst_16 = arith.constant dense<0.000000e+00> : vector<8x128xf32>
    %58 = tpu.matmul %55, %57, %cst_16 {dimension_numbers = #tpu.dot_dimension_numbers<[1], [0], [0], [1], [0, 0, 1, 1], [], []>} : vector<8x128xbf16>, vector<128x128xbf16>, vector<8x128xf32> -> vector<8x128xf32>
    %59 = arith.addf %56, %58 : vector<8x128xf32>
    %c0_17 = arith.constant 0 : index
    %c0_18 = arith.constant 0 : index
    %60 = vector.load %arg12[%c0_17, %c0_18] : memref<8x128xf32, #tpu.memory_space<vmem>>, vector<8x128xf32>
    tpu.vector_store %arg12[%c0_17, %c0_18], %59 {strides = array<i32>} : memref<8x128xf32, #tpu.memory_space<vmem>>, vector<8x128xf32>,
    %c0_19 = arith.constant 0 : index
    %c0_20 = arith.constant 0 : index
    %61 = vector.load %arg13[%c0_19, %c0_20] : memref<8x1xf32, #tpu.memory_space<vmem>>, vector<8x1xf32>
    %62 = arith.extf %55 : vector<8x128xbf16> to vector<8x128xf32>
    %cst_21 = arith.constant dense<0.000000e+00> : vector<8xf32>
    %63 = vector.multi_reduction <add>, %62, %cst_21 [1] : vector<8x128xf32> to vector<8xf32>
    %64 = vector.shape_cast %63 : vector<8xf32> to vector<8x1xf32>
    %65 = arith.addf %61, %64 : vector<8x1xf32>
    %c0_22 = arith.constant 0 : index
    %c0_23 = arith.constant 0 : index
    %66 = vector.load %arg13[%c0_22, %c0_23] : memref<8x1xf32, #tpu.memory_space<vmem>>, vector<8x1xf32>
    tpu.vector_store %arg13[%c0_22, %c0_23], %65 {strides = array<i32>} : memref<8x1xf32, #tpu.memory_space<vmem>>, vector<8x1xf32>,
    %c2_i32 = arith.constant 2 : i32
    %67 = arith.cmpi eq, %arg1, %c2_i32 : i32
    %68 = arith.extui %67 : i1 to i32
    %c0_i32_24 = arith.constant 0 : i32
    %69 = arith.cmpi ne, %68, %c0_i32_24 : i32
    scf.if %69 {
      %c0_25 = arith.constant 0 : index
      %c0_26 = arith.constant 0 : index
      %70 = vector.load %arg13[%c0_25, %c0_26] : memref<8x1xf32, #tpu.memory_space<vmem>>, vector<8x1xf32>
      %cst_27 = arith.constant 1.000000e+00 : f32
      %71 = vector.broadcast %cst_27 : f32 to vector<8x1xf32>
      %72 = arith.maximumf %70, %71 : vector<8x1xf32>
      %cst_28 = arith.constant 1.000000e+00 : f32
      %73 = vector.broadcast %cst_28 : f32 to vector<8x1xf32>
      %74 = arith.divf %73, %72 : vector<8x1xf32>
      %c0_29 = arith.constant 0 : index
      %c0_30 = arith.constant 0 : index
      %75 = vector.load %arg12[%c0_29, %c0_30] : memref<8x128xf32, #tpu.memory_space<vmem>>, vector<8x128xf32>
      %76 = vector.broadcast %74 : vector<8x1xf32> to vector<8x128xf32>
      %77 = arith.mulf %75, %76 : vector<8x128xf32>
      %c0_31 = arith.constant 0 : index
      %c0_32 = arith.constant 0 : index
      %78 = vector.load %arg7[%c0_31, %c0_32] : memref<128x32xf32, #tpu.memory_space<vmem>>, vector<128x32xf32>
      %cst_33 = arith.constant dense<0.000000e+00> : vector<8x32xf32>
      %79 = tpu.matmul %77, %78, %cst_33 {dimension_numbers = #tpu.dot_dimension_numbers<[1], [0], [0], [1], [0, 0, 1, 1], [], []>} : vector<8x128xf32>, vector<128x32xf32>, vector<8x32xf32> -> vector<8x32xf32>
      %c0_34 = arith.constant 0 : index
      %c0_35 = arith.constant 0 : index
      %80 = vector.load %arg8[%c0_34, %c0_35] : memref<1x32xf32, #tpu.memory_space<vmem>>, vector<1x32xf32>
      %81 = vector.broadcast %80 : vector<1x32xf32> to vector<8x32xf32>
      %82 = arith.addf %79, %81 : vector<8x32xf32>
      %cst_36 = arith.constant dense<0.000000e+00> : vector<8xf32>
      %83 = vector.multi_reduction <add>, %82, %cst_36 [1] : vector<8x32xf32> to vector<8xf32>
      %84 = vector.shape_cast %83 : vector<8xf32> to vector<8x1xf32>
      %cst_37 = arith.constant 3.200000e+01 : f32
      %85 = vector.broadcast %cst_37 : f32 to vector<8x1xf32>
      %86 = arith.divf %84, %85 : vector<8x1xf32>
      %87 = vector.broadcast %86 : vector<8x1xf32> to vector<8x32xf32>
      %88 = arith.subf %82, %87 : vector<8x32xf32>
      %89 = arith.mulf %88, %88 : vector<8x32xf32>
      %cst_38 = arith.constant dense<0.000000e+00> : vector<8xf32>
      %90 = vector.multi_reduction <add>, %89, %cst_38 [1] : vector<8x32xf32> to vector<8xf32>
      %91 = vector.shape_cast %90 : vector<8xf32> to vector<8x1xf32>
      %cst_39 = arith.constant 3.200000e+01 : f32
      %92 = vector.broadcast %cst_39 : f32 to vector<8x1xf32>
      %93 = arith.divf %91, %92 : vector<8x1xf32>
      %94 = vector.broadcast %86 : vector<8x1xf32> to vector<8x32xf32>
      %95 = arith.subf %82, %94 : vector<8x32xf32>
      %cst_40 = arith.constant 9.99999974E-6 : f32
      %96 = vector.broadcast %cst_40 : f32 to vector<8x1xf32>
      %97 = arith.addf %93, %96 : vector<8x1xf32>
      %98 = math.rsqrt %97 : vector<8x1xf32>
      %99 = vector.broadcast %98 : vector<8x1xf32> to vector<8x32xf32>
      %100 = arith.mulf %95, %99 : vector<8x32xf32>
      %c0_41 = arith.constant 0 : index
      %c0_42 = arith.constant 0 : index
      %101 = vector.load %arg9[%c0_41, %c0_42] : memref<1x32xf32, #tpu.memory_space<vmem>>, vector<1x32xf32>
      %102 = vector.broadcast %101 : vector<1x32xf32> to vector<8x32xf32>
      %103 = arith.mulf %100, %102 : vector<8x32xf32>
      %c0_43 = arith.constant 0 : index
      %c0_44 = arith.constant 0 : index
      %104 = vector.load %arg10[%c0_43, %c0_44] : memref<1x32xf32, #tpu.memory_space<vmem>>, vector<1x32xf32>
      %105 = vector.broadcast %104 : vector<1x32xf32> to vector<8x32xf32>
      %106 = arith.addf %103, %105 : vector<8x32xf32>
      %107 = arith.negf %106 : vector<8x32xf32>
      %108 = math.exp %107 : vector<8x32xf32>
      %cst_45 = arith.constant 1.000000e+00 : f32
      %109 = vector.broadcast %cst_45 : f32 to vector<8x32xf32>
      %110 = arith.addf %109, %108 : vector<8x32xf32>
      %111 = arith.divf %109, %110 : vector<8x32xf32>
      %112 = arith.mulf %106, %111 : vector<8x32xf32>
      %c0_46 = arith.constant 0 : index
      %c0_47 = arith.constant 0 : index
      %113 = vector.load %arg11[%c0_46, %c0_47] : memref<8x32xf32, #tpu.memory_space<vmem>>, vector<8x32xf32>
      tpu.vector_store %arg11[%c0_46, %c0_47], %112 {strides = array<i32>} : memref<8x32xf32, #tpu.memory_space<vmem>>, vector<8x32xf32>,
    } else {
    }
    return
  }
  func.func @transform_0(%arg0: i32, %arg1: i32) -> (i32, i32) {
    %c0_i32 = arith.constant 0 : i32
    %c0_i32_0 = arith.constant 0 : i32
    return %arg1, %c0_i32 : i32, i32
  }
  func.func @transform_1(%arg0: i32, %arg1: i32) -> (i32, i32) {
    %c0_i32 = arith.constant 0 : i32
    %c0_i32_0 = arith.constant 0 : i32
    return %c0_i32, %arg1 : i32, i32
  }
  func.func @transform_2(%arg0: i32, %arg1: i32) -> (i32, i32) {
    %c0_i32 = arith.constant 0 : i32
    %c0_i32_0 = arith.constant 0 : i32
    %c0_i32_1 = arith.constant 0 : i32
    return %c0_i32, %c0_i32_0 : i32, i32
  }
  func.func @transform_3(%arg0: i32, %arg1: i32) -> (i32, i32) {
    %c0_i32 = arith.constant 0 : i32
    %c0_i32_0 = arith.constant 0 : i32
    %c0_i32_1 = arith.constant 0 : i32
    return %c0_i32, %c0_i32_0 : i32, i32
  }
  func.func @transform_4(%arg0: i32, %arg1: i32) -> (i32, i32) {
    %c0_i32 = arith.constant 0 : i32
    %c0_i32_0 = arith.constant 0 : i32
    %c0_i32_1 = arith.constant 0 : i32
    return %c0_i32, %c0_i32_0 : i32, i32
  }
  func.func @transform_5(%arg0: i32, %arg1: i32) -> (i32, i32) {
    %c0_i32 = arith.constant 0 : i32
    %c0_i32_0 = arith.constant 0 : i32
    %c0_i32_1 = arith.constant 0 : i32
    return %c0_i32, %c0_i32_0 : i32, i32
  }
  func.func @transform_6(%arg0: i32, %arg1: i32) -> (i32, i32) {
    %c0_i32 = arith.constant 0 : i32
    %c0_i32_0 = arith.constant 0 : i32
    %c0_i32_1 = arith.constant 0 : i32
    return %c0_i32, %c0_i32_0 : i32, i32
  }
  func.func @transform_7(%arg0: i32, %arg1: i32) -> (i32, i32) {
    %c0_i32 = arith.constant 0 : i32
    %c0_i32_0 = arith.constant 0 : i32
    %c0_i32_1 = arith.constant 0 : i32
    return %c0_i32, %c0_i32_0 : i32, i32
  }
  func.func @transform_8(%arg0: i32, %arg1: i32) -> (i32, i32) {
    %c0_i32 = arith.constant 0 : i32
    %c0_i32_0 = arith.constant 0 : i32
    %c0_i32_1 = arith.constant 0 : i32
    return %c0_i32, %c0_i32_0 : i32, i32
  }
  func.func @transform_9(%arg0: i32, %arg1: i32) -> (i32, i32) {
    %c0_i32 = arith.constant 0 : i32
    %c0_i32_0 = arith.constant 0 : i32
    return %arg0, %c0_i32 : i32, i32
  }
}

</mosaic_0001>

<bundles_post_ra>
// kernel: tpu_custom_call.1
= control target key start
LH: loop header
LB: loop body
LE: loop exit
PB: predicated region body
PF: predicated region fallthrough
CT: control target
= control target key end

     0   :  { %14 = vsyncpa [#allocation5], 0  ;;  %s3003_s0 = inlined_call_operand.vmem [shape: f32[384,3], index: 0, kind: input, shape index: {}]   ;;  %s3004_s1 = inlined_call_operand.vmem [shape: s32[1,384], index: 1, kind: input, shape index: {}]   ;;  %s3005_s2 = inlined_call_operand.vmem [shape: f32[3,384], index: 2, kind: input, shape index: {}]   ;;  %s3006_s3 = inlined_call_operand.vmem [shape: f32[1,384], index: 3, kind: input, shape index: {}]   ;;  %s3007_s4 = inlined_call_operand.vmem [shape: f32[128,128], index: 4, kind: input, shape index: {}]   ;;  %s3008_s5 = inlined_call_operand.vmem [shape: f32[128,32], index: 5, kind: input, shape index: {}]   ;;  %s3009_s6 = inlined_call_operand.vmem [shape: f32[1,32], index: 6, kind: input, shape index: {}]   ;;  %s3010_s7 = inlined_call_operand.vmem [shape: f32[1,32], index: 7, kind: input, shape index: {}]   ;;  %s3011_s8 = inlined_call_operand.vmem [shape: f32[1,32], index: 8, kind: input, shape index: {}]   ;;  %s3012_s9 = inlined_call_operand.hbm [shape: f32[16,32], index: 9, kind: output, shape index: {}]  }
   0x1   :  { %16 = vsyncpa [#allocation5 + $0x1], 0  ;;  %s2190_s30 = smov 0   ;;  %s2192_s10 = smov 0  }
   0x2   :  { %s2194_s11 = smov 0   ;;  %s2196_s12 = smov 0  }
   0x3   :  { %s2198_s13 = smov 0   ;;  %s2200_s14 = smov 0  }
   0x4   :  { %s2202_s15 = smov 0   ;;  %s2204_s16 = smov 0  }
   0x5 LB: > { %3016 = sst [smem:[#allocation7_spill]] %s2119_s14  ;;  %s1662_s17 = sadd.s32 4294967295, %s2127_s16   ;;  %s2127_s16 = sphi %s2204_s16, %s22_s16   ;;  %s2123_s15 = sphi %s2202_s15, %s3025_s15   ;;  %s2119_s14 = sphi %s2200_s14, %s3024_s14   ;;  %s2115_s13 = sphi %s2198_s13, %s3023_s13   ;;  %s2111_s12 = sphi %s2196_s12, %s3022_s12   ;;  %s2107_s11 = sphi %s2194_s11, %s3028_s11   ;;  %s2103_s10 = sphi %s2192_s10, %s3027_s10   ;;  %s2099_s30 = sphi %s2190_s30, %s3026_s30  }
   0x6   : > { %3017 = sst [smem:[#allocation8_spill]] %s2123_s15  ;;  %s1663_s18 = sadd.s32 4294967294, %s2127_s16  }
   0x7   : > { %s31_s19 = sadd.s32 1, %s2119_s14  ;;  %s34_s20 = sadd.s32 1, %s2123_s15 }
   0x8   : > { %p32_p0 = scmp.ge.s32.totalorder %s31_s19, 3  ;;  %p250_p1 = scmp.ne.s32.totalorder %s2107_s11, %s2103_s10 }
   0x9   : > { %p251_p2 = scmp.eq.s32.totalorder %s1662_s17, 5  ;;  %p256_p4 = scmp.ne.s32.totalorder %s2103_s10, %s2099_s30 }
   0xa   : > { %s3030_s19 = smov (%p32_p0, %s31_s19), 0  ;;  %s3032_s20 = smov (!%p32_p0, %s34_s20), %s2123_s15 }
   0xb   : > { %3018 = sst [smem:[#allocation9_spill]] %s3030_s19  ;;  %p2239_p3 = por %p251_p2, %p250_p1 }
   0xc   : > { %p36_p5 = scmp.ge.s32.totalorder %s3032_s20, 2  ;;  %p257_p6 = scmp.eq.s32.totalorder %s1663_s18, 5 }
   0xd   : > { %p1666_p7 = scmp.ge.s32.totalorder %s2127_s16, 1  ;;  %p311_p8 = scmp.lt.s32.totalorder %s2127_s16, 7 }
   0xe   : > { %s3034_s20 = smov (%p36_p5, %s3032_s20), 0  ;;  %p2249_p9 = por %p257_p6, %p256_p4 }
   0xf   : > { %3020 = sst [smem:[#allocation10_spill]] %s3034_s20  ;;  %p312_p10 = pnand %p1666_p7, %p311_p8 }
  0x10   : > { %s237_s23 = ssub.s32 %s2123_s15, %s3034_s20  ;;  %s240_s24 = sadd.s32 1, %s2107_s11 }
  0x11   : > { %p238_p11 = scmp.eq.s32.totalorder %s237_s23, 0  ;;  %315 = sbr.rel (%p312_p10) target bundleno = 1756 (0x6dc), region = 56 }
  0x12   : > { %s347_s26 = sand.u32 (!%p312_p10), 1, %s2103_s10   ;;  %s1668_s27 = sshll.u32 (!%p312_p10), %s2111_s12, 4 }
  0x13   : > { %s2257_s25 = scalar_select %p238_p11, %s2107_s11, %s240_s24  }
  0x14   : > { %s2263_s28 = sshll.u32 (!%p312_p10), %s347_s26, 3  ;;  %p351_p12 = scmp.lt.s32.totalorder (!%p312_p10), %s1668_s27, 47 }
  0x15   : > { %p356_p13 = scmp.lt.s32.totalorder (!%p312_p10), %s2111_s12, 2  ;;  %s349_s14 = scalar_lea.vmem (!%p312_p10), [#allocation4], %s2263_s28 }
  0x16   : > { %s3036_s27 = smov (!%p351_p12, %s1668_s27), 47  ;;  %p1670_p0 = scmp.ne.s32.totalorder %s2111_s12, 0 }
  0x17   : > { %s2267_s29 = scalar_select %p356_p13, %s2111_s12, 2 }
  0x18   : > { %s1669_s17 = sshll.u32 %s3036_s27, 3  ;;  %363 = sbr.rel (%p1670_p0) target bundleno = 31 (0x1f), region = 60 }
  0x19   : > { %s2272_s24 = scalar_lea.vmem %s3003_s0, %s1669_s17  ;;  %s358_s15 = scalar_lea.vmem %s3004_s1, %s2267_s29 }
  0x1d   : > { %vm365_vm0 = vcmask 7168   ;;  %v2129_v0 = vmov 0.0  }
  0x1e   : > { %364 = vst [vmem:[#allocation2] sm:$0xff] %v2129_v0  ;;  %366 = vst.msk [vmem:[#allocation3] sm:$0xff] %vm365_vm0, %v2129_v0 }
  0x1f PF: > { %v2281_v1 = vld [vmem:[%s2272_s24 + $0x8] sm:$0xff]  ;;  %v367_v2 = vld [vmem:[%s2272_s24] sm:$0xff]  ;;  %v2130_v3 = vmov 1   ;;  %v2131_v4 = vmov 0   ;;  %v467_v5 = vlaneseq  ;;  %v2298_v8 = vld [vmem:[%s2272_s24 + $0x18] sm:$0xff]  ;;  %v2132_v11 = vmov 2  }
  0x20   : > { %1935 = vset.pattern.permute.xlu0 %v2130_v3  ;;  %1937 = vset.pattern.permute.xlu1 %v2131_v4  ;;  %v2295_v7 = vld [vmem:[%s3006_s3] sm:$0x7]  ;;  %v1012_v12 = vld [vmem:[%s3007_s4 + $0x78] sm:$0xff]  ;;  %v2313_v13 = vld [vmem:[%s2272_s24 + $0x28] sm:$0xff]  ;;  %vm2134_vm1 = vmmov 0   ;;  %vm1420_vm4 = vcmask 7168  }
  0x21   : > { %392 = vperm.xlu1 %1937, %v2281_v1   ;;  %543 = vperm.xlu0 %1935, %v367_v2   ;;  %v2289_v6 = vshrl.u32 %v467_v5, 7  ;;  %v1011_v14 = vld [vmem:[%s3007_s4 + $0x70] sm:$0xff]  ;;  %v1010_v16 = vld [vmem:[%s3007_s4 + $0x68] sm:$0xff]  ;;  %v2325_v17 = vld [vmem:[%s2272_s24 + $0x38] sm:$0xff]  ;;  %p1676_p1 = scmp.ne.s32.totalorder %s2111_s12, 2 }
  0x22   : > { %1743 = vmatprep.subr.mxu0 %v1012_v12  ;;  %v369_v15 = vld [vmem:[%s2272_s24 + $0x10] sm:$0xff]  ;;  %v1009_v18 = vld [vmem:[%s3007_s4 + $0x60] sm:$0xff]  ;;  %v1008_v19 = vld [vmem:[%s3007_s4 + $0x58] sm:$0xff] }
  0x23   : > { %v2301_v9 = vsub.s32 2, %v2289_v6  ;;  %1744 = vmatpush3.msra.mxu0 %v1012_v12  ;;  %v2335_v20 = vld [vmem:[%s2272_s24 + $0x48] sm:$0xff]  ;;  %v1007_v21 = vld [vmem:[%s3007_s4 + $0x50] sm:$0xff]  ;;  %v2346_v23 = vld [vmem:[%s2272_s24 + $0x58] sm:$0xff]  ;;  %v469_v40 = vsub.s32 0, %v2289_v6  ;;  %v608_v42 = vsub.s32 1, %v2289_v6 }
  0x24   : > { %1745 = vmatprep.subr.mxu0 %v1011_v14  ;;  %v1006_v22 = vld [vmem:[%s3007_s4 + $0x48] sm:$0xff]  ;;  %v1005_v24 = vld [vmem:[%s3007_s4 + $0x40] sm:$0xff]  ;;  %v1004_v25 = vld [vmem:[%s3007_s4 + $0x38] sm:$0xff]  ;;  %v612_v44 = vsub.s32 5, %v2289_v6  ;;  %v473_v47 = vsub.s32 4, %v2289_v6  ;;  %v799_v51 = vsub.s32 6, %v2289_v6 }
  0x25   : > { %1938 = vset.pattern.permute.xlu1 %v2130_v3  ;;  %1936 = vset.pattern.permute.xlu0 %v2131_v4  ;;  %v2305_v10 = vrot.slane %v2295_v7, %v2301_v9  ;;  %v2357_v26 = vld [vmem:[%s2272_s24 + $0x68] sm:$0xff]  ;;  %v1003_v27 = vld [vmem:[%s3007_s4 + $0x30] sm:$0xff]  ;;  %v2368_v29 = vld [vmem:[%s2272_s24 + $0x78] sm:$0xff] }
  0x26   : > { %547 = vperm.xlu1 %1938, %v2281_v1   ;;  %387 = vperm.xlu0 %1936, %v367_v2   ;;  %v1002_v28 = vld [vmem:[%s3007_s4 + $0x28] sm:$0xff]  ;;  %v371_v30 = vld [vmem:[%s2272_s24 + $0x20] sm:$0xff]  ;;  %v1000_v32 = vld [vmem:[%s3007_s4 + $0x18] sm:$0xff] }
  0x27   : > { %1746 = vmatpush3.msra.mxu0 %v1011_v14  ;;  %v1001_v31 = vld [vmem:[%s3007_s4 + $0x20] sm:$0xff]  ;;  %v999_v33 = vld [vmem:[%s3007_s4 + $0x10] sm:$0xff]  ;;  %v998_v34 = vld [vmem:[%s3007_s4 + $0x8] sm:$0xff] }
  0x28   : > { %1747 = vmatprep.subr.mxu0 %v1010_v16  ;;  %v997_v35 = vld [vmem:[%s3007_s4] sm:$0xff]  ;;  %v373_v36 = vld [vmem:[%s2272_s24 + $0x30] sm:$0xff]  ;;  %v384_v41 = vld [vmem:[%s3005_s2 + $0x8] sm:$0x7] }
  0x29   : > { %1748 = vmatpush3.msra.mxu0 %v1010_v16  ;;  %v375_v37 = vld [vmem:[%s2272_s24 + $0x40] sm:$0xff]  ;;  %v377_v38 = vld [vmem:[%s2272_s24 + $0x50] sm:$0xff]  ;;  %v478_v43 = vrot.slane %v384_v41, %v469_v40  ;;  %v617_v45 = vrot.slane %v384_v41, %v608_v42  ;;  %v804_v0 = vrot.slane %v384_v41, %v2301_v9 }
  0x2a   : > { %1939 = vset.pattern.permute.xlu1 %v2132_v11  ;;  %402 = vperm.xlu0 %1936, %v2298_v8   ;;  %v379_v39 = vld [vmem:[%s2272_s24 + $0x60] sm:$0xff]  ;;  %v381_v62 = vld [vmem:[%s2272_s24 + $0x70] sm:$0xff]  ;;  %s1671_s24 = sshll.u32 %s2115_s13, 3 }
  0x2b   : > { %730 = vperm.xlu1 %1939, %v367_v2   ;;  %1749 = vmatprep.subr.mxu0 %v1009_v18  ;;  %v383_v46 = vld [vmem:[%s3005_s2] sm:$0x77]  ;;  %v2429_v48 = vrot.slane %v478_v43, %v469_v40  ;;  %v2435_v54 = vrot.slane %v617_v45, %v608_v42 }
  0x2c   : > { %1750 = vmatpush3.msra.mxu0 %v1009_v18  ;;  %v609_v49 = vrot.slane %v383_v46, %v608_v42  ;;  %v613_v50 = vrot.slane %v383_v46, %v612_v44  ;;  %v470_v52 = vrot.slane %v383_v46, %v469_v40  ;;  %v474_v56 = vrot.slane %v383_v46, %v473_v47 }
  0x2d   : > { %1751 = vmatprep.subr.mxu0 %v1008_v19  ;;  %v796_v59 = vrot.slane %v383_v46, %v2301_v9  ;;  %v800_v63 = vrot.slane %v383_v46, %v799_v51 }
  0x2e   : > { %412 = vperm.xlu0 %1936, %v2313_v13   ;;  %1752 = vmatpush3.msra.mxu0 %v1008_v19  ;;  %v2441_v60 = vrot.slane %v609_v49, %v608_v42  ;;  %v2443_v61 = vrot.slane %v613_v50, %v608_v42  ;;  %v2449_v2 = vrot.slane %v474_v56, %v469_v40 }
  0x2f   : > { %1940 = vset.pattern.permute.xlu1 %v2131_v4  ;;  %1753 = vmatprep.subr.mxu0 %v1007_v21  ;;  %v2457_v16 = vrot.slane %v796_v59, %v2301_v9  ;;  %v2462_v19 = vrot.slane %v800_v63, %v2301_v9 }
  0x30   : > { %397 = vperm.xlu1 %1940, %v369_v15   ;;  %1754 = vmatpush3.msra.mxu0 %v1007_v21 }
  0x31   : > { %1755 = vmatprep.subr.mxu0 %v1006_v22 }
  0x32   : > { %422 = vperm.xlu0 %1936, %v2325_v17   ;;  %1756 = vmatpush3.msra.mxu0 %v1006_v22 }
  0x33   : > { %1757 = vmatprep.subr.mxu0 %v1005_v24 }
  0x34   : > { %1941 = vset.pattern.permute.xlu1 %v2130_v3  ;;  %1758 = vmatpush3.msra.mxu0 %v1005_v24 }
  0x35   : > { %551 = vperm.xlu1 %1941, %v369_v15   ;;  %1759 = vmatprep.subr.mxu0 %v1004_v25 }
  0x36   : > { %432 = vperm.xlu0 %1936, %v2335_v20   ;;  %1760 = vmatpush3.msra.mxu0 %v1004_v25 }
  0x37   : > { %1761 = vmatprep.subr.mxu0 %v1003_v27 }
  0x38   : > { %1762 = vmatpush3.msra.mxu0 %v1003_v27  ;;  %v2472_v27 = vrot.slane %v2295_v7, %v469_v40 }
  0x39   : > { %555 = vperm.xlu1 %1941, %v2298_v8   ;;  %1763 = vmatprep.subr.mxu0 %v1002_v28 }
  0x3a   : > { %442 = vperm.xlu0 %1936, %v2346_v23   ;;  %1764 = vmatpush3.msra.mxu0 %v1002_v28 }
  0x3b   : > { %1765 = vmatprep.subr.mxu0 %v1001_v31 }
  0x3c   : > { %1766 = vmatpush3.msra.mxu0 %v1001_v31  ;;  %v2478_v31 = vrot.slane %v2295_v7, %v608_v42 }
  0x3d   : > { %1942 = vset.pattern.permute.xlu1 %v2132_v11  ;;  %1767 = vmatprep.subr.mxu0 %v1000_v32 }
  0x3e   : > { %738 = vperm.xlu1 %1942, %v369_v15   ;;  %452 = vperm.xlu0 %1936, %v2357_v26  }
  0x3f   : > { %1768 = vmatpush3.msra.mxu0 %v1000_v32 }
  0x40   : > { %1769 = vmatprep.subr.mxu0 %v999_v33 }
  0x41   : > { %1770 = vmatpush3.msra.mxu0 %v999_v33 }
  0x42   : > { %1943 = vset.pattern.permute.xlu1 %v2131_v4  ;;  %462 = vperm.xlu0 %1936, %v2368_v29  }
  0x43   : > { %407 = vperm.xlu1 %1943, %v371_v30   ;;  %1771 = vmatprep.subr.mxu0 %v998_v34 }
  0x44   : > { %1772 = vmatpush3.msra.mxu0 %v998_v34 }
  0x45   : > { %1773 = vmatprep.subr.mxu0 %v997_v35 }
  0x46   : > { %1960 = vset.pattern.permute.xlu0 %v2132_v11  ;;  %1774 = vmatpush3.msra.mxu0 %v997_v35 }
  0x47   : > { %1944 = vset.pattern.permute.xlu1 %v2130_v3  ;;  %734 = vperm.xlu0 %1960, %v2281_v1   ;;  %v2447_v1 = vrot.slane %v470_v52, %v469_v40 }
  0x48   : > { %559 = vperm.xlu1 %1944, %v371_v30  }
  0x4b   : > { %742 = vperm.xlu0 %1960, %v2298_v8  }
  0x4c   : > { %563 = vperm.xlu1 %1944, %v2313_v13  }
  0x4f   : > { %750 = vperm.xlu0 %1960, %v2313_v13  }
  0x50   : > { %1945 = vset.pattern.permute.xlu1 %v2132_v11 }
  0x51   : > { %746 = vperm.xlu1 %1945, %v371_v30  }
  0x53   : > { %758 = vperm.xlu0 %1960, %v2325_v17  }
  0x55   : > { %1946 = vset.pattern.permute.xlu1 %v2131_v4 }
  0x56   : > { %417 = vperm.xlu1 %1946, %v373_v36  }
  0x57   : > { %766 = vperm.xlu0 %1960, %v2335_v20  }
  0x5a   : > { %1947 = vset.pattern.permute.xlu1 %v2130_v3 }
  0x5b   : > { %567 = vperm.xlu1 %1947, %v373_v36   ;;  %774 = vperm.xlu0 %1960, %v2346_v23  }
  0x5f   : > { %571 = vperm.xlu1 %1947, %v2325_v17   ;;  %782 = vperm.xlu0 %1960, %v2357_v26  }
  0x63   : > { %1948 = vset.pattern.permute.xlu1 %v2132_v11  ;;  %790 = vperm.xlu0 %1960, %v2368_v29  }
  0x64   : > { %754 = vperm.xlu1 %1948, %v373_v36  }
  0x68   : > { %1949 = vset.pattern.permute.xlu1 %v2131_v4 }
  0x69   : > { %427 = vperm.xlu1 %1949, %v375_v37  }
  0x6d   : > { %1950 = vset.pattern.permute.xlu1 %v2130_v3 }
  0x6e   : > { %575 = vperm.xlu1 %1950, %v375_v37  }
  0x72   : > { %579 = vperm.xlu1 %1950, %v2335_v20   ;;  %v2465_v20 = vrot.slane %v804_v0, %v2301_v9 }
  0x76   : > { %1951 = vset.pattern.permute.xlu1 %v2132_v11 }
  0x77   : > { %762 = vperm.xlu1 %1951, %v375_v37  }
  0x7b   : > { %1952 = vset.pattern.permute.xlu1 %v2131_v4 }
  0x7c   : > { %437 = vperm.xlu1 %1952, %v377_v38  }
  0x80   : > { %1953 = vset.pattern.permute.xlu1 %v2130_v3 }
  0x81   : > { %583 = vperm.xlu1 %1953, %v377_v38  }
  0x85   : > { %587 = vperm.xlu1 %1953, %v2346_v23  }
  0x89   : > { %1954 = vset.pattern.permute.xlu1 %v2132_v11 }
  0x8a   : > { %770 = vperm.xlu1 %1954, %v377_v38  }
  0x8e   : > { %1955 = vset.pattern.permute.xlu1 %v2131_v4 }
  0x8f   : > { %447 = vperm.xlu1 %1955, %v379_v39  }
  0x93   : > { %1956 = vset.pattern.permute.xlu1 %v2130_v3 }
  0x94   : > { %591 = vperm.xlu1 %1956, %v379_v39  }
  0x98   : > { %595 = vperm.xlu1 %1956, %v2357_v26  }
  0x9c   : > { %v2432_v53 = vpop.permute.xlu1 %392  ;;  %1957 = vset.pattern.permute.xlu1 %v2132_v11  ;;  %v544_v55 = vpop.permute.xlu0 %543 }
  0x9d   : > { %v499_v57 = vmul.f32 %v2429_v48, %v2432_v53  ;;  %778 = vperm.xlu1 %1957, %v379_v39   ;;  %v635_v58 = vmul.f32 %v2435_v54, %v544_v55  ;;  %v633_v5 = vmul.f32 %v2441_v60, %v544_v55  ;;  %v634_v8 = vmul.f32 %v2443_v61, %v544_v55 }
  0x9e   : > { %v497_v59 = vmul.f32 %v2447_v1, %v2432_v53 }
  0xa1   : > { %v548_v12 = vpop.permute.xlu1 %547  ;;  %1958 = vset.pattern.permute.xlu1 %v2131_v4  ;;  %v388_v13 = vpop.permute.xlu0 %387 }
  0xa2   : > { %v638_v14 = vmul.f32 %v2435_v54, %v548_v12  ;;  %457 = vperm.xlu1 %1958, %v381_v62   ;;  %v494_v15 = vmul.f32 %v2447_v1, %v388_v13  ;;  %v495_v17 = vmul.f32 %v2449_v2, %v388_v13  ;;  %v496_v18 = vmul.f32 %v2429_v48, %v388_v13 }
  0xa3   : > { %v636_v0 = vmul.f32 %v2441_v60, %v548_v12 }
  0xa4   : > { %v2467_v4 = vadd.f32 %v638_v14, %v499_v57  ;;  %v681_v21 = vadd.f32 %v633_v5, %v494_v15  ;;  %v682_v22 = vadd.f32 %v634_v8, %v495_v17  ;;  %v683_v23 = vadd.f32 %v635_v58, %v496_v18 }
  0xa5   : > { %v403_v24 = vpop.permute.xlu0 %402  ;;  %v637_v5 = vmul.f32 %v2443_v61, %v548_v12 }
  0xa6   : > { %1959 = vset.pattern.permute.xlu1 %v2130_v3  ;;  %v731_v25 = vpop.permute.xlu1 %730  ;;  %v505_v26 = vmul.f32 %v2429_v48, %v403_v24  ;;  %v503_v12 = vmul.f32 %v2447_v1, %v403_v24 }
  0xa7   : > { %v820_v28 = vmul.f32 %v2457_v16, %v731_v25  ;;  %v821_v30 = vmul.f32 %v2462_v19, %v731_v25  ;;  %v822_v9 = vmul.f32 %v2465_v20, %v731_v25  ;;  %599 = vperm.xlu1 %1959, %v381_v62  }
  0xa9   : > { %v870_v32 = vadd.f32 %v822_v9, %v683_v23  ;;  %v413_v33 = vpop.permute.xlu0 %412  ;;  %v868_v34 = vadd.f32 %v820_v28, %v681_v21  ;;  %v869_v3 = vadd.f32 %v821_v30, %v682_v22  ;;  %v498_v28 = vmul.f32 %v2449_v2, %v2432_v53 }
  0xaa   : > { %v2481_v35 = vmul.f32 %v2429_v48, %v413_v33  ;;  %v504_v30 = vmul.f32 %v2449_v2, %v403_v24 }
  0xab   : > { %v2484_v36 = vadd.f32 %v2305_v10, %v870_v32  ;;  %603 = vperm.xlu1 %1959, %v2368_v29   ;;  %v398_v37 = vpop.permute.xlu1 %397  ;;  %v933_v38 = vadd.f32 %v2472_v27, %v868_v34  ;;  %v934_v39 = vadd.f32 %v2478_v31, %v869_v3  ;;  %v684_v34 = vadd.f32 %v636_v0, %v497_v59 }
  0xac   : > { %v502_v7 = vmul.f32 %v2429_v48, %v398_v37  ;;  %v500_v8 = vmul.f32 %v2447_v1, %v398_v37  ;;  %v501_v15 = vmul.f32 %v2449_v2, %v398_v37  ;;  %v685_v37 = vadd.f32 %v637_v5, %v498_v28 }
  0xad   : > { %v2490_v40 = vpop.permute.xlu0 %422  ;;  %v981_v41 = vmul.f32 %v934_v39, %v933_v38  ;;  %v509_v38 = vmul.f32 %v2447_v1, %v413_v33  ;;  %v510_v39 = vmul.f32 %v2449_v2, %v413_v33 }
  0xae   : > { %v2494_v42 = vmul.f32 %v2429_v48, %v2490_v40 }
  0xaf   : > { %1961 = vset.pattern.permute.xlu1 %v2132_v11  ;;  %1775 = vmatprep.mubr.f32.mxu0 %v981_v41 }
  0xb0   : > { %786 = vperm.xlu1 %1961, %v381_v62   ;;  %v552_v43 = vpop.permute.xlu1 %551 }
  0xb1   : > { %v641_v29 = vmul.f32 %v2435_v54, %v552_v43  ;;  %v2498_v44 = vpop.permute.xlu0 %432  ;;  %v639_v57 = vmul.f32 %v2441_v60, %v552_v43  ;;  %v640_v62 = vmul.f32 %v2443_v61, %v552_v43 }
  0xb2   : > { %v2502_v45 = vmul.f32 %v2429_v48, %v2498_v44 }
  0xb3   : > { %v689_v46 = vadd.f32 %v641_v29, %v502_v7  ;;  %v687_v23 = vadd.f32 %v639_v57, %v500_v8  ;;  %v688_v9 = vadd.f32 %v640_v62, %v501_v15 }
  0xb4   : > { %v556_v47 = vpop.permute.xlu1 %555 }
  0xb5   : > { %v644_v49 = vmul.f32 %v2435_v54, %v556_v47  ;;  %v2505_v50 = vpop.permute.xlu0 %442  ;;  %v642_v25 = vmul.f32 %v2441_v60, %v556_v47  ;;  %v643_v32 = vmul.f32 %v2443_v61, %v556_v47 }
  0xb6   : > { %v2509_v11 = vmul.f32 %v2429_v48, %v2505_v50 }
  0xb7   : > { %v2511_v51 = vadd.f32 %v644_v49, %v505_v26  ;;  %v690_v43 = vadd.f32 %v642_v25, %v503_v12  ;;  %v691_v49 = vadd.f32 %v643_v32, %v504_v30 }
  0xb9   : > { %v739_v52 = vpop.permute.xlu1 %738  ;;  %v2513_v55 = vpop.permute.xlu0 %452 }
  0xba   : > { %v828_v56 = vmul.f32 %v2465_v20, %v739_v52  ;;  %v2519_v58 = vmul.f32 %v2429_v48, %v2513_v55  ;;  %v826_v13 = vmul.f32 %v2457_v16, %v739_v52  ;;  %v827_v17 = vmul.f32 %v2462_v19, %v739_v52 }
  0xbc   : > { %v876_v63 = vadd.f32 %v828_v56, %v689_v46  ;;  %v874_v3 = vadd.f32 %v826_v13, %v687_v23  ;;  %v875_v7 = vadd.f32 %v827_v17, %v688_v9 }
  0xbd   : > { %v2528_v14 = vpop.permute.xlu0 %462 }
  0xbe   : > { %v2533_v18 = vadd.f32 %v2305_v10, %v876_v63  ;;  %v408_v21 = vpop.permute.xlu1 %407  ;;  %v2537_v22 = vmul.f32 %v2429_v48, %v2528_v14  ;;  %v939_v62 = vadd.f32 %v2472_v27, %v874_v3  ;;  %v940_v13 = vadd.f32 %v2478_v31, %v875_v7 }
  0xbf   : > { %v508_v26 = vmul.f32 %v2429_v48, %v408_v21  ;;  %v506_v47 = vmul.f32 %v2447_v1, %v408_v21  ;;  %v507_v52 = vmul.f32 %v2449_v2, %v408_v21 }
  0xc2   : > { %v735_v41 = vpop.permute.xlu0 %734 }
  0xc3   : > { %v823_v29 = vmul.f32 %v2457_v16, %v735_v41  ;;  %v824_v46 = vmul.f32 %v2462_v19, %v735_v41  ;;  %v825_v53 = vmul.f32 %v2465_v20, %v735_v41  ;;  %v560_v24 = vpop.permute.xlu1 %559 }
  0xc4   : > { %v647_v56 = vmul.f32 %v2435_v54, %v560_v24  ;;  %v645_v63 = vmul.f32 %v2441_v60, %v560_v24  ;;  %v646_v0 = vmul.f32 %v2443_v61, %v560_v24 }
  0xc5   : > { %v871_v57 = vadd.f32 %v823_v29, %v684_v34  ;;  %v872_v59 = vadd.f32 %v824_v46, %v685_v37  ;;  %v873_v33 = vadd.f32 %v825_v53, %v2467_v4  ;;  %v983_v29 = vmul.f32 %v940_v13, %v939_v62 }
  0xc6   : > { %v695_v5 = vadd.f32 %v647_v56, %v508_v26  ;;  %v743_v8 = vpop.permute.xlu0 %742 }
  0xc7   : > { %v2560_v15 = vadd.f32 %v2305_v10, %v873_v33  ;;  %v829_v17 = vmul.f32 %v2457_v16, %v743_v8  ;;  %v830_v21 = vmul.f32 %v2462_v19, %v743_v8  ;;  %v831_v12 = vmul.f32 %v2465_v20, %v743_v8  ;;  %v564_v4 = vpop.permute.xlu1 %563 }
  0xc8   : > { %v648_v23 = vmul.f32 %v2441_v60, %v564_v4  ;;  %v649_v25 = vmul.f32 %v2443_v61, %v564_v4  ;;  %v650_v28 = vmul.f32 %v2435_v54, %v564_v4  ;;  %v936_v26 = vadd.f32 %v2472_v27, %v871_v57 }
  0xc9   : > { %v877_v30 = vadd.f32 %v829_v17, %v690_v43  ;;  %v878_v9 = vadd.f32 %v830_v21, %v691_v49  ;;  %v879_v32 = vadd.f32 %v831_v12, %v2511_v51  ;;  %v937_v34 = vadd.f32 %v2478_v31, %v872_v59 }
  0xca   : > { %v696_v3 = vadd.f32 %v648_v23, %v509_v38  ;;  %v697_v37 = vadd.f32 %v649_v25, %v510_v39  ;;  %v698_v7 = vadd.f32 %v650_v28, %v2481_v35  ;;  %v751_v41 = vpop.permute.xlu0 %750  ;;  %v693_v49 = vadd.f32 %v645_v63, %v506_v47 }
  0xcb   : > { %v2573_v46 = vadd.f32 %v2305_v10, %v879_v32  ;;  %v835_v53 = vmul.f32 %v2457_v16, %v751_v41  ;;  %v836_v24 = vmul.f32 %v2462_v19, %v751_v41  ;;  %v837_v43 = vmul.f32 %v2465_v20, %v751_v41 }
  0xcc   : > { %v982_v56 = vmul.f32 %v937_v34, %v936_v26  ;;  %v747_v51 = vpop.permute.xlu1 %746  ;;  %v942_v57 = vadd.f32 %v2472_v27, %v877_v30  ;;  %v943_v38 = vadd.f32 %v2478_v31, %v878_v9  ;;  %v694_v39 = vadd.f32 %v646_v0, %v507_v52 }
  0xcd   : > { %v883_v35 = vadd.f32 %v835_v53, %v696_v3  ;;  %v885_v59 = vadd.f32 %v837_v43, %v698_v7  ;;  %v832_v33 = vmul.f32 %v2457_v16, %v747_v51  ;;  %v884_v62 = vadd.f32 %v836_v24, %v697_v37 }
  0xce   : > { %1776 = vmatmul.mubr.f32.vlgmr.msra.gmra.mxu0 %v982_v56  ;;  %v833_v8 = vmul.f32 %v2462_v19, %v747_v51  ;;  %v834_v13 = vmul.f32 %v2465_v20, %v747_v51  ;;  %v984_v17 = vmul.f32 %v943_v38, %v942_v57  ;;  %v759_v21 = vpop.permute.xlu0 %758  ;;  %v515_v53 = vmul.f32 %v2447_v1, %v2490_v40 }
  0xcf   : > { %v2584_v47 = vadd.f32 %v2305_v10, %v885_v59  ;;  %v880_v63 = vadd.f32 %v832_v33, %v693_v49  ;;  %1778 = vmatprep.mubr.f32.mxu0 %v983_v29  ;;  %v843_v23 = vmul.f32 %v2465_v20, %v759_v21  ;;  %v948_v26 = vadd.f32 %v2472_v27, %v883_v35 }
  0xd0   : > { %v881_v12 = vadd.f32 %v833_v8, %v694_v39  ;;  %v882_v4 = vadd.f32 %v834_v13, %v695_v5  ;;  %v949_v30 = vadd.f32 %v2478_v31, %v884_v62  ;;  %v516_v24 = vmul.f32 %v2449_v2, %v2490_v40 }
  0xd1   : > { %v418_v52 = vpop.permute.xlu1 %417  ;;  %v945_v0 = vadd.f32 %v2472_v27, %v880_v63  ;;  %v841_v56 = vmul.f32 %v2457_v16, %v759_v21  ;;  %v842_v51 = vmul.f32 %v2462_v19, %v759_v21 }
  0xd2   : > { %v2589_v25 = vadd.f32 %v2305_v10, %v882_v4  ;;  %1779 = vmatmul.mubr.f32.gmra.mxu0 %v984_v17  ;;  %v514_v28 = vmul.f32 %v2429_v48, %v418_v52  ;;  %v767_v9 = vpop.permute.xlu0 %766  ;;  %v946_v32 = vadd.f32 %v2478_v31, %v881_v12  ;;  %v986_v37 = vmul.f32 %v949_v30, %v948_v26 }
  0xd3   : > { %v2596_v5 = vmul.f32 %v2465_v20, %v767_v9  ;;  %v512_v62 = vmul.f32 %v2447_v1, %v418_v52  ;;  %v513_v21 = vmul.f32 %v2449_v2, %v418_v52 }
  0xd4   : > { %v985_v34 = vmul.f32 %v946_v32, %v945_v0 }
  0xd6   : > { %v568_v3 = vpop.permute.xlu1 %567  ;;  %v2598_v7 = vpop.permute.xlu0 %774  ;;  %1781 = vmatprep.mubr.f32.mxu0 %v985_v34 }
  0xd7   : > { %v653_v41 = vmul.f32 %v2435_v54, %v568_v3  ;;  %1782 = vmatmul.mubr.f32.gmra.mxu0 %v986_v37  ;;  %v2603_v29 = vmul.f32 %v2465_v20, %v2598_v7  ;;  %v651_v57 = vmul.f32 %v2441_v60, %v568_v3  ;;  %v652_v33 = vmul.f32 %v2443_v61, %v568_v3 }
  0xd9   : > { %v701_v43 = vadd.f32 %v653_v41, %v514_v28  ;;  %v699_v63 = vadd.f32 %v651_v57, %v512_v62  ;;  %v700_v26 = vadd.f32 %v652_v33, %v513_v21  ;;  %v522_v33 = vmul.f32 %v2449_v2, %v2498_v44 }
  0xda   : > { %v572_v49 = vpop.permute.xlu1 %571  ;;  %v2615_v59 = vpop.permute.xlu0 %782 }
  0xdb   : > { %v654_v38 = vmul.f32 %v2441_v60, %v572_v49  ;;  %v655_v39 = vmul.f32 %v2443_v61, %v572_v49  ;;  %v656_v35 = vmul.f32 %v2435_v54, %v572_v49  ;;  %v2620_v40 = vmul.f32 %v2465_v20, %v2615_v59 }
  0xdd   : > { %v702_v8 = vadd.f32 %v654_v38, %v515_v53  ;;  %v703_v13 = vadd.f32 %v655_v39, %v516_v24  ;;  %v704_v17 = vadd.f32 %v656_v35, %v2494_v42  ;;  %v521_v35 = vmul.f32 %v2447_v1, %v2498_v44 }
  0xdf   : > { %v889_v12 = vadd.f32 %v841_v56, %v702_v8  ;;  %v890_v4 = vadd.f32 %v842_v51, %v703_v13  ;;  %v891_v0 = vadd.f32 %v843_v23, %v704_v17  ;;  %v755_v28 = vpop.permute.xlu1 %754  ;;  %v847_v13 = vmul.f32 %v2457_v16, %v767_v9 }
  0xe0   : > { %v838_v30 = vmul.f32 %v2457_v16, %v755_v28  ;;  %v839_v32 = vmul.f32 %v2462_v19, %v755_v28  ;;  %v840_v34 = vmul.f32 %v2465_v20, %v755_v28  ;;  %v848_v17 = vmul.f32 %v2462_v19, %v767_v9 }
  0xe1   : > { %v2629_v3 = vadd.f32 %v2305_v10, %v891_v0  ;;  %v954_v52 = vadd.f32 %v2472_v27, %v889_v12  ;;  %v955_v53 = vadd.f32 %v2478_v31, %v890_v4 }
  0xe2   : > { %v886_v37 = vadd.f32 %v838_v30, %v699_v63  ;;  %v887_v41 = vadd.f32 %v839_v32, %v700_v26  ;;  %v888_v42 = vadd.f32 %v840_v34, %v701_v43 }
  0xe3   : > { %v988_v38 = vmul.f32 %v955_v53, %v954_v52 }
  0xe4   : > { %v2634_v23 = vadd.f32 %v2305_v10, %v888_v42  ;;  %v428_v24 = vpop.permute.xlu1 %427  ;;  %v951_v49 = vadd.f32 %v2472_v27, %v886_v37  ;;  %v952_v56 = vadd.f32 %v2478_v31, %v887_v41 }
  0xe5   : > { %v520_v51 = vmul.f32 %v2429_v48, %v428_v24  ;;  %v518_v28 = vmul.f32 %v2447_v1, %v428_v24  ;;  %v519_v32 = vmul.f32 %v2449_v2, %v428_v24 }
  0xe6   : > { %v987_v57 = vmul.f32 %v952_v56, %v951_v49 }
  0xe8   : > { %1784 = vmatprep.mubr.f32.mxu0 %v987_v57 }
  0xe9   : > { %v576_v39 = vpop.permute.xlu1 %575  ;;  %1785 = vmatmul.mubr.f32.gmra.mxu0 %v988_v38 }
  0xea   : > { %v659_v43 = vmul.f32 %v2435_v54, %v576_v39  ;;  %v657_v21 = vmul.f32 %v2441_v60, %v576_v39  ;;  %v658_v0 = vmul.f32 %v2443_v61, %v576_v39 }
  0xec   : > { %v707_v62 = vadd.f32 %v659_v43, %v520_v51  ;;  %v705_v34 = vadd.f32 %v657_v21, %v518_v28  ;;  %v706_v52 = vadd.f32 %v658_v0, %v519_v32  ;;  %v853_v28 = vmul.f32 %v2457_v16, %v2598_v7 }
  0xed   : > { %v580_v8 = vpop.permute.xlu1 %579 }
  0xee   : > { %v660_v63 = vmul.f32 %v2441_v60, %v580_v8  ;;  %v661_v12 = vmul.f32 %v2443_v61, %v580_v8  ;;  %v662_v4 = vmul.f32 %v2435_v54, %v580_v8 }
  0xf0   : > { %v708_v26 = vadd.f32 %v660_v63, %v521_v35  ;;  %v709_v44 = vadd.f32 %v661_v12, %v522_v33  ;;  %v710_v30 = vadd.f32 %v662_v4, %v2502_v45  ;;  %v527_v12 = vmul.f32 %v2447_v1, %v2505_v50 }
  0xf1   : > { %v528_v4 = vmul.f32 %v2449_v2, %v2505_v50 }
  0xf2   : > { %v895_v9 = vadd.f32 %v847_v13, %v708_v26  ;;  %v896_v37 = vadd.f32 %v848_v17, %v709_v44  ;;  %v897_v41 = vadd.f32 %v2596_v5, %v710_v30  ;;  %v763_v42 = vpop.permute.xlu1 %762  ;;  %v854_v26 = vmul.f32 %v2462_v19, %v2598_v7 }
  0xf3   : > { %v844_v53 = vmul.f32 %v2457_v16, %v763_v42  ;;  %v845_v49 = vmul.f32 %v2462_v19, %v763_v42  ;;  %v846_v56 = vmul.f32 %v2465_v20, %v763_v42 }
  0xf4   : > { %v2659_v51 = vadd.f32 %v2305_v10, %v897_v41  ;;  %v960_v24 = vadd.f32 %v2472_v27, %v895_v9  ;;  %v961_v39 = vadd.f32 %v2478_v31, %v896_v37 }
  0xf5   : > { %v892_v57 = vadd.f32 %v844_v53, %v705_v34  ;;  %v893_v45 = vadd.f32 %v845_v49, %v706_v52  ;;  %v894_v38 = vadd.f32 %v846_v56, %v707_v62 }
  0xf6   : > { %v990_v17 = vmul.f32 %v961_v39, %v960_v24 }
  0xf7   : > { %v2664_v5 = vadd.f32 %v2305_v10, %v894_v38  ;;  %v438_v43 = vpop.permute.xlu1 %437  ;;  %v957_v35 = vadd.f32 %v2472_v27, %v892_v57  ;;  %v958_v33 = vadd.f32 %v2478_v31, %v893_v45 }
  0xf8   : > { %v526_v8 = vmul.f32 %v2429_v48, %v438_v43  ;;  %v524_v37 = vmul.f32 %v2447_v1, %v438_v43  ;;  %v525_v52 = vmul.f32 %v2449_v2, %v438_v43 }
  0xf9   : > { %v989_v13 = vmul.f32 %v958_v33, %v957_v35 }
  0xfb   : > { %1787 = vmatprep.mubr.f32.mxu0 %v989_v13 }
  0xfc   : > { %v584_v21 = vpop.permute.xlu1 %583  ;;  %1788 = vmatmul.mubr.f32.gmra.mxu0 %v990_v17 }
  0xfd   : > { %v665_v62 = vmul.f32 %v2435_v54, %v584_v21  ;;  %v663_v44 = vmul.f32 %v2441_v60, %v584_v21  ;;  %v664_v9 = vmul.f32 %v2443_v61, %v584_v21 }
  0xff   : > { %v713_v63 = vadd.f32 %v665_v62, %v526_v8  ;;  %v711_v53 = vadd.f32 %v663_v44, %v524_v37  ;;  %v712_v45 = vadd.f32 %v664_v9, %v525_v52  ;;  %v533_v44 = vmul.f32 %v2447_v1, %v2513_v55 }
 0x100   : > { %v588_v0 = vpop.permute.xlu1 %587 }
 0x101   : > { %v666_v30 = vmul.f32 %v2441_v60, %v588_v0  ;;  %v667_v32 = vmul.f32 %v2443_v61, %v588_v0  ;;  %v668_v34 = vmul.f32 %v2435_v54, %v588_v0 }
 0x103   : > { %v714_v50 = vadd.f32 %v666_v30, %v527_v12  ;;  %v715_v41 = vadd.f32 %v667_v32, %v528_v4  ;;  %v716_v42 = vadd.f32 %v668_v34, %v2509_v11  ;;  %v534_v30 = vmul.f32 %v2449_v2, %v2513_v55 }
 0x105   : > { %v901_v7 = vadd.f32 %v853_v28, %v714_v50  ;;  %v902_v49 = vadd.f32 %v854_v26, %v715_v41  ;;  %v903_v56 = vadd.f32 %v2603_v29, %v716_v42  ;;  %v771_v57 = vpop.permute.xlu1 %770  ;;  %v859_v41 = vmul.f32 %v2457_v16, %v2615_v59 }
 0x106   : > { %v850_v38 = vmul.f32 %v2457_v16, %v771_v57  ;;  %v851_v24 = vmul.f32 %v2462_v19, %v771_v57  ;;  %v852_v39 = vmul.f32 %v2465_v20, %v771_v57  ;;  %v860_v42 = vmul.f32 %v2462_v19, %v2615_v59 }
 0x107   : > { %v2691_v35 = vadd.f32 %v2305_v10, %v903_v56  ;;  %v966_v43 = vadd.f32 %v2472_v27, %v901_v7  ;;  %v967_v13 = vadd.f32 %v2478_v31, %v902_v49 }
 0x108   : > { %v898_v33 = vadd.f32 %v850_v38, %v711_v53  ;;  %v899_v11 = vadd.f32 %v851_v24, %v712_v45  ;;  %v900_v8 = vadd.f32 %v852_v39, %v713_v63 }
 0x109   : > { %v992_v0 = vmul.f32 %v967_v13, %v966_v43 }
 0x10a   : > { %v2696_v29 = vadd.f32 %v2305_v10, %v900_v8  ;;  %v448_v17 = vpop.permute.xlu1 %447  ;;  %v963_v21 = vadd.f32 %v2472_v27, %v898_v33  ;;  %v964_v62 = vadd.f32 %v2478_v31, %v899_v11 }
 0x10b   : > { %v532_v12 = vmul.f32 %v2429_v48, %v448_v17  ;;  %v530_v53 = vmul.f32 %v2447_v1, %v448_v17  ;;  %v531_v56 = vmul.f32 %v2449_v2, %v448_v17 }
 0x10c   : > { %v991_v4 = vmul.f32 %v964_v62, %v963_v21 }
 0x10e   : > { %1790 = vmatprep.mubr.f32.mxu0 %v991_v4 }
 0x10f   : > { %v592_v28 = vpop.permute.xlu1 %591  ;;  %1791 = vmatmul.mubr.f32.gmra.mxu0 %v992_v0 }
 0x110   : > { %v671_v63 = vmul.f32 %v2435_v54, %v592_v28  ;;  %v669_v34 = vmul.f32 %v2441_v60, %v592_v28  ;;  %v670_v52 = vmul.f32 %v2443_v61, %v592_v28 }
 0x112   : > { %v719_v26 = vadd.f32 %v671_v63, %v532_v12  ;;  %v717_v57 = vadd.f32 %v669_v34, %v530_v53  ;;  %v718_v33 = vadd.f32 %v670_v52, %v531_v56 }
 0x113   : > { %v596_v32 = vpop.permute.xlu1 %595 }
 0x114   : > { %v672_v9 = vmul.f32 %v2441_v60, %v596_v32  ;;  %v673_v37 = vmul.f32 %v2443_v61, %v596_v32  ;;  %v674_v50 = vmul.f32 %v2435_v54, %v596_v32  ;;  %v791_v32 = vpop.permute.xlu0 %790 }
 0x115   : > { %v865_v53 = vmul.f32 %v2457_v16, %v791_v32 }
 0x116   : > { %v720_v55 = vadd.f32 %v672_v9, %v533_v44  ;;  %v721_v7 = vadd.f32 %v673_v37, %v534_v30  ;;  %v722_v49 = vadd.f32 %v674_v50, %v2519_v58  ;;  %v539_v9 = vmul.f32 %v2447_v1, %v2528_v14 }
 0x117   : > { %v540_v37 = vmul.f32 %v2449_v2, %v2528_v14 }
 0x118   : > { %v907_v45 = vadd.f32 %v859_v41, %v720_v55  ;;  %v908_v38 = vadd.f32 %v860_v42, %v721_v7  ;;  %v909_v24 = vadd.f32 %v2620_v40, %v722_v49  ;;  %v779_v39 = vpop.permute.xlu1 %778  ;;  %v866_v55 = vmul.f32 %v2462_v19, %v791_v32 }
 0x119   : > { %v856_v11 = vmul.f32 %v2457_v16, %v779_v39  ;;  %v857_v59 = vmul.f32 %v2462_v19, %v779_v39  ;;  %v858_v8 = vmul.f32 %v2465_v20, %v779_v39  ;;  %v867_v7 = vmul.f32 %v2465_v20, %v791_v32 }
 0x11a   : > { %v2723_v43 = vadd.f32 %v2305_v10, %v909_v24  ;;  %v972_v17 = vadd.f32 %v2472_v27, %v907_v45  ;;  %v973_v62 = vadd.f32 %v2478_v31, %v908_v38 }
 0x11b   : > { %v904_v13 = vadd.f32 %v856_v11, %v717_v57  ;;  %v905_v58 = vadd.f32 %v857_v59, %v718_v33  ;;  %v906_v21 = vadd.f32 %v858_v8, %v719_v26 }
 0x11c   : > { %v994_v44 = vmul.f32 %v973_v62, %v972_v17 }
 0x11d   : > { %v2728_v40 = vadd.f32 %v2305_v10, %v906_v21  ;;  %v458_v12 = vpop.permute.xlu1 %457  ;;  %v969_v4 = vadd.f32 %v2472_v27, %v904_v13  ;;  %v970_v0 = vadd.f32 %v2478_v31, %v905_v58 }
 0x11e   : > { %v538_v28 = vmul.f32 %v2429_v48, %v458_v12  ;;  %v536_v56 = vmul.f32 %v2447_v1, %v458_v12 }
 0x11f   : > { %v993_v63 = vmul.f32 %v970_v0, %v969_v4 }
 0x121   : > { %1793 = vmatprep.mubr.f32.mxu0 %v993_v63 }
 0x122   : > { %v600_v30 = vpop.permute.xlu1 %599  ;;  %1794 = vmatmul.mubr.f32.gmra.mxu0 %v994_v44 }
 0x123   : > { %v677_v26 = vmul.f32 %v2435_v54, %v600_v30  ;;  %v675_v41 = vmul.f32 %v2441_v60, %v600_v30  ;;  %v676_v49 = vmul.f32 %v2443_v61, %v600_v30 }
 0x125   : > { %v725_v34 = vadd.f32 %v677_v26, %v538_v28  ;;  %v723_v38 = vadd.f32 %v675_v41, %v536_v56 }
 0x126   : > { %v604_v50 = vpop.permute.xlu1 %603 }
 0x127   : > { %v678_v48 = vmul.f32 %v2441_v60, %v604_v50  ;;  %v679_v42 = vmul.f32 %v2443_v61, %v604_v50  ;;  %v680_v52 = vmul.f32 %v2435_v54, %v604_v50  ;;  %v537_v60 = vmul.f32 %v2449_v2, %v458_v12 }
 0x129   : > { %v726_v14 = vadd.f32 %v678_v48, %v539_v9  ;;  %v727_v57 = vadd.f32 %v679_v42, %v540_v37  ;;  %v728_v45 = vadd.f32 %v680_v52, %v2537_v22  ;;  %v724_v11 = vadd.f32 %v676_v49, %v537_v60 }
 0x12b   : > { %v913_v24 = vadd.f32 %v865_v53, %v726_v14  ;;  %v914_v39 = vadd.f32 %v866_v55, %v727_v57  ;;  %v787_v54 = vpop.permute.xlu1 %786  ;;  %v915_v33 = vadd.f32 %v867_v7, %v728_v45 }
 0x12c   : > { %v862_v59 = vmul.f32 %v2457_v16, %v787_v54  ;;  %v863_v8 = vmul.f32 %v2462_v19, %v787_v54  ;;  %v864_v61 = vmul.f32 %v2465_v20, %v787_v54 }
 0x12d   : > { %v2753_v1 = vadd.f32 %v2305_v10, %v915_v33  ;;  %v978_v2 = vadd.f32 %v2472_v27, %v913_v24  ;;  %v979_v21 = vadd.f32 %v2478_v31, %v914_v39 }
 0x12e   : > { %v910_v13 = vadd.f32 %v862_v59, %v723_v38  ;;  %v911_v58 = vadd.f32 %v863_v8, %v724_v11  ;;  %v912_v22 = vadd.f32 %v864_v61, %v725_v34 }
 0x12f   : > { %v996_v12 = vmul.f32 %v979_v21, %v978_v2 }
 0x130   : > { %v975_v17 = vadd.f32 %v2472_v27, %v910_v13  ;;  %v976_v62 = vadd.f32 %v2478_v31, %v911_v58  ;;  %v2760_v16 = vadd.f32 %v2305_v10, %v912_v22 }
 0x132   : > { %v995_v19 = vmul.f32 %v976_v62, %v975_v17 }
 0x134   : > { %1796 = vmatprep.mubr.f32.mxu0 %v995_v19 }
 0x135   : > { %1797 = vmatmul.mubr.f32.gmra.mxu0 %v996_v12 }
 0x18e   : > { %v1777_v20 = vpop.f32.mrf.mxu0 }
 0x18f   : > { %v2770_v24 = vmul.f32 0.17677669, %v1777_v20 }
 0x190   : > { %v1079_v4 = vpop.f32.mrf.mxu0 }
 0x191   : > { %v2773_v39 = vmul.f32 0.17677669, %v1079_v4 }
 0x192   : > { %v1780_v0 = vpop.f32.mrf.mxu0 }
 0x193   : > { %v2764_v60 = vmul.f32 0.17677669, %v1780_v0 }
 0x194   : > { %v1089_v28 = vpop.f32.mrf.mxu0 }
 0x195   : > { %v2767_v38 = vmul.f32 0.17677669, %v1089_v28 }
 0x197   : > { %v1783_v63 = vpop.f32.mrf.mxu0 }
 0x198   : > { %v1163_v57 = vmul.f32 0.17677669, %v1783_v63 }
 0x199   : > { %v1099_v44 = vpop.f32.mrf.mxu0 }
 0x19a   : > { %v2762_v45 = vmul.f32 0.17677669, %v1099_v44 }
 0x1a9   : > { %v1786_v30 = vpop.f32.mrf.mxu0 }
 0x1aa   : > { %v1165_v56 = vmul.f32 0.17677669, %v1786_v30 }
 0x1ab   : > { %v1109_v26 = vpop.f32.mrf.mxu0 }
 0x1ac   : > { %v1164_v14 = vmul.f32 0.17677669, %v1109_v26 }
 0x1bc   : > { %v1789_v32 = vpop.f32.mrf.mxu0 }
 0x1bd   : > { %v1167_v7 = vmul.f32 0.17677669, %v1789_v32 }
 0x1be   : > { %v1119_v34 = vpop.f32.mrf.mxu0 }
 0x1bf   : > { %v1166_v49 = vmul.f32 0.17677669, %v1119_v34 }
 0x1cf   : > { %v1792_v27 = vpop.f32.mrf.mxu0 }
 0x1d0   : > { %v1169_v53 = vmul.f32 0.17677669, %v1792_v27 }
 0x1d1   : > { %v1129_v9 = vpop.f32.mrf.mxu0 }
 0x1d2   : > { %v1168_v55 = vmul.f32 0.17677669, %v1129_v9 }
 0x1e2   : > { %v1795_v31 = vpop.f32.mrf.mxu0 }
 0x1e3   : > { %v1171_v42 = vmul.f32 0.17677669, %v1795_v31 }
 0x1e4   : > { %v1139_v37 = vpop.f32.mrf.mxu0 }
 0x1e5   : > { %v1170_v52 = vmul.f32 0.17677669, %v1139_v37 }
 0x1f5   : > { %v1798_v10 = vpop.f32.mrf.mxu0 }
 0x1f6   : > { %v1173_v50 = vmul.f32 0.17677669, %v1798_v10 }
 0x1f7   : > { %v1149_v41 = vpop.f32.mrf.mxu0 }
 0x1f8   : > { %v1172_v48 = vmul.f32 0.17677669, %v1149_v41  ;;  %1204 = vmax.xlane.f32.xlu0 %v1173_v50 }
 0x1fa   : > { %1202 = vmax.xlane.f32.xlu1 %v1172_v48 }
 0x1fc   : > { %1200 = vmax.xlane.f32.xlu0 %v1171_v42 }
 0x1fe   : > { %1198 = vmax.xlane.f32.xlu1 %v1170_v52 }
 0x200   : > { %1196 = vmax.xlane.f32.xlu0 %v1169_v53 }
 0x202   : > { %1194 = vmax.xlane.f32.xlu1 %v1168_v55 }
 0x204   : > { %1192 = vmax.xlane.f32.xlu0 %v1167_v7 }
 0x206   : > { %1190 = vmax.xlane.f32.xlu1 %v1166_v49 }
 0x208   : > { %1188 = vmax.xlane.f32.xlu0 %v1165_v56 }
 0x20a   : > { %1186 = vmax.xlane.f32.xlu1 %v1164_v14 }
 0x20c   : > { %1184 = vmax.xlane.f32.xlu0 %v1163_v57 }
 0x20e   : > { %1182 = vmax.xlane.f32.xlu1 %v2762_v45 }
 0x210   : > { %1180 = vmax.xlane.f32.xlu0 %v2764_v60 }
 0x212   : > { %1178 = vmax.xlane.f32.xlu1 %v2767_v38 }
 0x214   : > { %1176 = vmax.xlane.f32.xlu0 %v2770_v24 }
 0x216   : > { %1174 = vmax.xlane.f32.xlu1 %v2773_v39 }
 0x281   : > { %v1205_v54 = vpop.xlane.xlu0 %1204 }
 0x282   : > { %v1221_v33 = vsub.f32 %v1173_v50, %v1205_v54 }
 0x283   : > { %v1203_v11 = vpop.xlane.xlu1 %1202 }
 0x284   : > { %v1252_v59 = vmul.f32 1.442695, %v1221_v33  ;;  %v1220_v8 = vsub.f32 %v1172_v48, %v1203_v11 }
 0x285   : > { %v1201_v61 = vpop.xlane.xlu0 %1200 }
 0x286   : > { %1962 = vpow2.f32 %v1252_v59  ;;  %v1250_v13 = vmul.f32 1.442695, %v1220_v8  ;;  %v1219_v58 = vsub.f32 %v1171_v42, %v1201_v61 }
 0x287   : > { %v1199_v22 = vpop.xlane.xlu1 %1198 }
 0x288   : > { %1964 = vpow2.f32 %v1250_v13  ;;  %v1248_v2 = vmul.f32 1.442695, %v1219_v58  ;;  %v1218_v21 = vsub.f32 %v1170_v52, %v1199_v22 }
 0x289   : > { %v1197_v17 = vpop.xlane.xlu0 %1196 }
 0x28a   : > { %1966 = vpow2.f32 %v1248_v2  ;;  %v1246_v62 = vmul.f32 1.442695, %v1218_v21  ;;  %v1217_v19 = vsub.f32 %v1169_v53, %v1197_v17 }
 0x28b   : > { %v1195_v12 = vpop.xlane.xlu1 %1194 }
 0x28c   : > { %1968 = vpow2.f32 %v1246_v62  ;;  %v1244_v20 = vmul.f32 1.442695, %v1217_v19  ;;  %v1216_v4 = vsub.f32 %v1168_v55, %v1195_v12 }
 0x28d   : > { %v1193_v0 = vpop.xlane.xlu0 %1192 }
 0x28e   : > { %1970 = vpow2.f32 %v1244_v20  ;;  %v1242_v28 = vmul.f32 1.442695, %v1216_v4  ;;  %v1215_v63 = vsub.f32 %v1167_v7, %v1193_v0  ;;  %v2133_v0 = vmov 0.0  }
 0x28f   : > { %v1191_v44 = vpop.xlane.xlu1 %1190  ;;  %1799 = vmatprep.subr.bf16.mxu1 %v2133_v0  ;;  %1815 = vmatprep.mubr.msk.bf16.mxu1 %vm2134_vm1, %v2133_v0 }
 0x290   : > { %1972 = vpow2.f32 %v1242_v28  ;;  %v1240_v30 = vmul.f32 1.442695, %v1215_v63  ;;  %v1214_v26 = vsub.f32 %v1166_v49, %v1191_v44  ;;  %v2838_v28 = vld [vmem:[%s358_s15] ss:$0 sm:$0xff]  ;;  %v1354_v63 = vstv %s1671_s24 }
 0x291   : > { %v1189_v32 = vpop.xlane.xlu0 %1188  ;;  %v2841_v44 = vadd.s32 %v1354_v63, %v2289_v6 }
 0x292   : > { %1974 = vpow2.f32 %v1240_v30  ;;  %v1238_v34 = vmul.f32 1.442695, %v1214_v26  ;;  %v1213_v27 = vsub.f32 %v1165_v56, %v1189_v32 }
 0x293   : > { %v2777_v9 = vpop.eup %1962  ;;  %v1187_v31 = vpop.xlane.xlu1 %1186  ;;  %vm1360_vm2 = vcmp.eq.s32.totalorder %v2841_v44, %v2838_v28 }
 0x294   : > { %1976 = vpow2.f32 %v1238_v34  ;;  %v1236_v37 = vmul.f32 1.442695, %v1213_v27  ;;  %v1212_v10 = vsub.f32 %v1164_v14, %v1187_v31  ;;  %1284 = vadd.xlane.f32.xlu0 %v2777_v9  ;;  %v1673_v30 = vsel %vm1360_vm2, 1.0, %v2133_v0  ;;  %vm1674_vm3 = vmpackc.low %vm1360_vm2, %vm1360_vm2 }
 0x295   : > { %v2780_v50 = vpop.eup %1964  ;;  %v1185_v41 = vpop.xlane.xlu0 %1184 }
 0x296   : > { %1978 = vpow2.f32 %v1236_v37  ;;  %v1234_v48 = vmul.f32 1.442695, %v1212_v10  ;;  %v1211_v42 = vsub.f32 %v1163_v57, %v1185_v41  ;;  %1282 = vadd.xlane.f32.xlu1 %v2780_v50 }
 0x297   : > { %v2783_v52 = vpop.eup %1966  ;;  %v1183_v53 = vpop.xlane.xlu1 %1182 }
 0x298   : > { %1980 = vpow2.f32 %v1234_v48  ;;  %v1232_v55 = vmul.f32 1.442695, %v1211_v42  ;;  %v1210_v7 = vsub.f32 %v2762_v45, %v1183_v53  ;;  %1280 = vadd.xlane.f32.xlu0 %v2783_v52 }
 0x299   : > { %v2787_v49 = vpop.eup %1968  ;;  %v1181_v56 = vpop.xlane.xlu0 %1180 }
 0x29a   : > { %1982 = vpow2.f32 %v1232_v55  ;;  %v1230_v14 = vmul.f32 1.442695, %v1210_v7  ;;  %v1209_v54 = vsub.f32 %v2764_v60, %v1181_v56  ;;  %1278 = vadd.xlane.f32.xlu1 %v2787_v49 }
 0x29b   : > { %v2791_v57 = vpop.eup %1970  ;;  %v1179_v33 = vpop.xlane.xlu1 %1178 }
 0x29c   : > { %1984 = vpow2.f32 %v1230_v14  ;;  %v1228_v11 = vmul.f32 1.442695, %v1209_v54  ;;  %v1208_v59 = vsub.f32 %v2767_v38, %v1179_v33  ;;  %1276 = vadd.xlane.f32.xlu0 %v2791_v57 }
 0x29d   : > { %v2795_v45 = vpop.eup %1972  ;;  %v1177_v8 = vpop.xlane.xlu0 %1176 }
 0x29e   : > { %1986 = vpow2.f32 %v1228_v11  ;;  %v1226_v61 = vmul.f32 1.442695, %v1208_v59  ;;  %v1207_v13 = vsub.f32 %v2770_v24, %v1177_v8  ;;  %1274 = vadd.xlane.f32.xlu1 %v2795_v45 }
 0x29f   : > { %v2799_v60 = vpop.eup %1974  ;;  %v1175_v58 = vpop.xlane.xlu1 %1174 }
 0x2a0   : > { %1988 = vpow2.f32 %v1226_v61  ;;  %v1224_v22 = vmul.f32 1.442695, %v1207_v13  ;;  %v1206_v2 = vsub.f32 %v2773_v39, %v1175_v58  ;;  %1272 = vadd.xlane.f32.xlu0 %v2799_v60 }
 0x2a1   : > { %v2803_v38 = vpop.eup %1976 }
 0x2a2   : > { %1990 = vpow2.f32 %v1224_v22  ;;  %v1222_v21 = vmul.f32 1.442695, %v1206_v2  ;;  %1270 = vadd.xlane.f32.xlu1 %v2803_v38 }
 0x2a3   : > { %v2806_v17 = vpop.eup %1978 }
 0x2a4   : > { %1992 = vpow2.f32 %v1222_v21  ;;  %1268 = vadd.xlane.f32.xlu0 %v2806_v17 }
 0x2a5   : > { %v2809_v24 = vpop.eup %1980 }
 0x2a6   : > { %1266 = vadd.xlane.f32.xlu1 %v2809_v24 }
 0x2a7   : > { %v2812_v62 = vpop.eup %1982 }
 0x2a8   : > { %1264 = vadd.xlane.f32.xlu0 %v2812_v62 }
 0x2a9   : > { %v2815_v39 = vpop.eup %1984 }
 0x2aa   : > { %1262 = vadd.xlane.f32.xlu1 %v2815_v39 }
 0x2ab   : > { %v2818_v19 = vpop.eup %1986 }
 0x2ac   : > { %1260 = vadd.xlane.f32.xlu0 %v2818_v19 }
 0x2ad   : > { %v2821_v12 = vpop.eup %1988 }
 0x2ae   : > { %1258 = vadd.xlane.f32.xlu1 %v2821_v12 }
 0x2af   : > { %v2824_v20 = vpop.eup %1990 }
 0x2b0   : > { %1256 = vadd.xlane.f32.xlu0 %v2824_v20 }
 0x2b1   : > { %v2827_v4 = vpop.eup %1992 }
 0x2b2   : > { %1254 = vadd.xlane.f32.xlu1 %v2827_v4 }
 0x2b6   : > { %1417 = vadd.xlane.f32.xlu1 %v1673_v30 }
 0x31d   : > { %v1285_v26 = vpop.xlane.xlu0 %1284 }
 0x31e   : > { %v1301_v32 = vmul.f32 0.03125, %v1285_v26 }
 0x31f   : > { %v1283_v34 = vpop.xlane.xlu1 %1282 }
 0x320   : > { %1994 = vrcp.f32 %v1301_v32  ;;  %v1300_v27 = vmul.f32 0.03125, %v1283_v34 }
 0x321   : > { %v1281_v31 = vpop.xlane.xlu0 %1280 }
 0x322   : > { %1996 = vrcp.f32 %v1300_v27  ;;  %v1299_v37 = vmul.f32 0.03125, %v1281_v31 }
 0x323   : > { %v1279_v10 = vpop.xlane.xlu1 %1278 }
 0x324   : > { %1998 = vrcp.f32 %v1299_v37  ;;  %v1298_v6 = vmul.f32 0.03125, %v1279_v10 }
 0x325   : > { %v1277_v41 = vpop.xlane.xlu0 %1276 }
 0x326   : > { %2000 = vrcp.f32 %v1298_v6  ;;  %v1297_v48 = vmul.f32 0.03125, %v1277_v41 }
 0x327   : > { %v1275_v42 = vpop.xlane.xlu1 %1274 }
 0x328   : > { %2002 = vrcp.f32 %v1297_v48  ;;  %v1296_v53 = vmul.f32 0.03125, %v1275_v42 }
 0x329   : > { %v1273_v55 = vpop.xlane.xlu0 %1272 }
 0x32a   : > { %2004 = vrcp.f32 %v1296_v53  ;;  %v1295_v7 = vmul.f32 0.03125, %v1273_v55 }
 0x32b   : > { %v1271_v56 = vpop.xlane.xlu1 %1270 }
 0x32c   : > { %2006 = vrcp.f32 %v1295_v7  ;;  %v1294_v14 = vmul.f32 0.03125, %v1271_v56 }
 0x32d   : > { %v1995_v54 = vpop.eup %1994  ;;  %v1269_v33 = vpop.xlane.xlu0 %1268 }
 0x32e   : > { %2008 = vrcp.f32 %v1294_v14  ;;  %v1293_v11 = vmul.f32 0.03125, %v1269_v33  ;;  %v1333_v59 = vmul.f32 %v1995_v54, %v2777_v9 }
 0x32f   : > { %v1997_v8 = vpop.eup %1996  ;;  %v1267_v61 = vpop.xlane.xlu1 %1266 }
 0x330   : > { %2010 = vrcp.f32 %v1293_v11  ;;  %v1292_v13 = vmul.f32 0.03125, %v1267_v61  ;;  %v1331_v58 = vmul.f32 %v1997_v8, %v2780_v50  ;;  %v1349_v21 = vmul.f32 %v1333_v59, %v2753_v1 }
 0x331   : > { %v1999_v22 = vpop.eup %1998  ;;  %v1265_v2 = vpop.xlane.xlu0 %1264 }
 0x332   : > { %2012 = vrcp.f32 %v1292_v13  ;;  %v1291_v63 = vmul.f32 0.03125, %v1265_v2  ;;  %v1348_v30 = vmul.f32 %v1331_v58, %v2760_v16  ;;  %v1329_v26 = vmul.f32 %v1999_v22, %v2783_v52 }
 0x333   : > { %v2001_v32 = vpop.eup %2000  ;;  %v1263_v34 = vpop.xlane.xlu1 %1262 }
 0x334   : > { %2014 = vrcp.f32 %v1291_v63  ;;  %v1290_v9 = vmul.f32 0.03125, %v1263_v34  ;;  %v1372_v27 = vpack.c.bf16 %v1349_v21, %v1348_v30  ;;  %v1327_v31 = vmul.f32 %v2001_v32, %v2787_v49 }
 0x335   : > { %v2003_v37 = vpop.eup %2002  ;;  %v1261_v10 = vpop.xlane.xlu0 %1260  ;;  %v1347_v50 = vmul.f32 %v1329_v26, %v2723_v43 }
 0x336   : > { %2016 = vrcp.f32 %v1290_v9  ;;  %v1289_v6 = vmul.f32 0.03125, %v1261_v10  ;;  %1800 = vmatpush3.bf16.msra.mxu1 %v1372_v27  ;;  %v1346_v1 = vmul.f32 %v1327_v31, %v2728_v40  ;;  %v1325_v16 = vmul.f32 %v2003_v37, %v2791_v57  ;;  %v1364_v27 = vld [vmem:[#allocation2] sm:$0xff] }
 0x337   : > { %v2005_v41 = vpop.eup %2004  ;;  %v1259_v52 = vpop.xlane.xlu1 %1258  ;;  %1801 = vmatprep.subr.bf16.mxu1 %v2133_v0 }
 0x338   : > { %2018 = vrcp.f32 %v1289_v6  ;;  %v1288_v48 = vmul.f32 0.03125, %v1259_v52  ;;  %v1371_v42 = vpack.c.bf16 %v1347_v50, %v1346_v1  ;;  %v1323_v49 = vmul.f32 %v2005_v41, %v2795_v45 }
 0x339   : > { %v2007_v53 = vpop.eup %2006  ;;  %v1257_v55 = vpop.xlane.xlu0 %1256  ;;  %v1345_v43 = vmul.f32 %v1325_v16, %v2691_v35 }
 0x33a   : > { %2020 = vrcp.f32 %v1288_v48  ;;  %v1287_v7 = vmul.f32 0.03125, %v1257_v55  ;;  %1802 = vmatpush3.bf16.msra.mxu1 %v1371_v42  ;;  %v1344_v40 = vmul.f32 %v1323_v49, %v2696_v29  ;;  %v1321_v57 = vmul.f32 %v2007_v53, %v2799_v60 }
 0x33b   : > { %v2009_v56 = vpop.eup %2008  ;;  %v1255_v14 = vpop.xlane.xlu1 %1254  ;;  %1803 = vmatprep.subr.bf16.mxu1 %v2133_v0 }
 0x33c   : > { %2022 = vrcp.f32 %v1287_v7  ;;  %v1286_v54 = vmul.f32 0.03125, %v1255_v14  ;;  %v1370_v33 = vpack.c.bf16 %v1345_v43, %v1344_v40  ;;  %v1319_v45 = vmul.f32 %v2009_v56, %v2803_v38 }
 0x33d   : > { %v2011_v11 = vpop.eup %2010  ;;  %v1343_v59 = vmul.f32 %v1321_v57, %v2659_v51 }
 0x33e   : > { %2024 = vrcp.f32 %v1286_v54  ;;  %1804 = vmatpush3.bf16.msra.mxu1 %v1370_v33  ;;  %v1342_v35 = vmul.f32 %v1319_v45, %v2664_v5  ;;  %v1317_v29 = vmul.f32 %v2011_v11, %v2806_v17 }
 0x33f   : > { %v2013_v8 = vpop.eup %2012  ;;  %1805 = vmatprep.subr.bf16.mxu1 %v2133_v0 }
 0x340   : > { %v1369_v60 = vpack.c.bf16 %v1343_v59, %v1342_v35  ;;  %v1315_v61 = vmul.f32 %v2013_v8, %v2809_v24  ;;  %v1341_v38 = vmul.f32 %v1317_v29, %v2629_v3 }
 0x341   : > { %v2015_v13 = vpop.eup %2014 }
 0x342   : > { %1806 = vmatpush3.bf16.msra.mxu1 %v1369_v60  ;;  %v1340_v58 = vmul.f32 %v1315_v61, %v2634_v23  ;;  %v1313_v22 = vmul.f32 %v2015_v13, %v2812_v62 }
 0x343   : > { %v2017_v2 = vpop.eup %2016  ;;  %1807 = vmatprep.subr.bf16.mxu1 %v2133_v0 }
 0x344   : > { %v1368_v51 = vpack.c.bf16 %v1341_v38, %v1340_v58  ;;  %v1311_v5 = vmul.f32 %v2017_v2, %v2815_v39  ;;  %v1339_v24 = vmul.f32 %v1313_v22, %v2584_v47 }
 0x345   : > { %v2019_v17 = vpop.eup %2018 }
 0x346   : > { %1808 = vmatpush3.bf16.msra.mxu1 %v1368_v51  ;;  %v1338_v21 = vmul.f32 %v1311_v5, %v2589_v25  ;;  %v1309_v63 = vmul.f32 %v2019_v17, %v2818_v19 }
 0x347   : > { %v2021_v30 = vpop.eup %2020  ;;  %1809 = vmatprep.subr.bf16.mxu1 %v2133_v0 }
 0x348   : > { %v1367_v3 = vpack.c.bf16 %v1339_v24, %v1338_v21  ;;  %v1307_v23 = vmul.f32 %v2021_v30, %v2821_v12  ;;  %v1337_v39 = vmul.f32 %v1309_v63, %v2573_v46  ;;  %v1415_v46 = vld [vmem:[#allocation3] sm:$0xff] }
 0x349   : > { %v2023_v62 = vpop.eup %2022 }
 0x34a   : > { %1810 = vmatpush3.bf16.msra.mxu1 %v1367_v3  ;;  %v1336_v26 = vmul.f32 %v1307_v23, %v2533_v18  ;;  %v1305_v32 = vmul.f32 %v2023_v62, %v2824_v20  ;;  %v2135_v18 = vmov 1.0|1.0   ;;  %v1418_v20 = vpop.xlane.xlu1 %1417 }
 0x34b   : > { %v2025_v34 = vpop.eup %2024  ;;  %1811 = vmatprep.subr.bf16.mxu1 %v2133_v0 }
 0x34c   : > { %v1366_v47 = vpack.c.bf16 %v1337_v39, %v1336_v26  ;;  %v1303_v25 = vmul.f32 %v2025_v34, %v2827_v4  ;;  %v1335_v9 = vmul.f32 %v1305_v32, %v2560_v15  ;;  %v1419_v4 = vadd.f32 %v1418_v20, %v1415_v46 }
 0x34e   : > { %1812 = vmatpush3.bf16.msra.mxu1 %v1366_v47  ;;  %v1334_v19 = vmul.f32 %v1303_v25, %v2484_v36  ;;  %1421 = vst.msk [vmem:[#allocation3] sm:$0xff] %vm1420_vm4, %v1419_v4 }
 0x34f   : > { %1813 = vmatprep.subr.bf16.mxu1 %v2133_v0 }
 0x350   : > { %v1365_v12 = vpack.c.bf16 %v1335_v9, %v1334_v19 }
 0x352   : > { %1814 = vmatpush3.bf16.msra.mxu1 %v1365_v12 }
 0x355   : > { %1816 = vmatmul.mubr.msk.bf16.vlgmr.msra.gmra.mxu1 %vm1674_vm3, %v2135_v18 }
 0x415   : > { %v1407_v36 = vpop.f32.mrf.mxu1 }
 0x416   : > { %v1413_v31 = vadd.f32 %v1407_v36, %v1364_v27 }
 0x417   : > { %v1817_v15 = vpop.f32.mrf.mxu1  ;;  %1425 = sbr.rel (%p1676_p1) target bundleno = 1733 (0x6c5), region = 64 }
 0x418   : > { %1414 = vst [vmem:[#allocation2] sm:$0xff] %v1413_v31 }
 0x419   : > { %v1410_v0 = vpop.f32.mrf.mxu1 }
 0x41b   : > { %v1818_v37 = vpop.f32.mrf.mxu1 }
 0x41c   : > { %v1426_v28 = vld [vmem:[#allocation3] sm:$0xff]  ;;  %v1452_v44 = vld [vmem:[%s3008_s5 + $0x78] sm:$0xff]  ;;  %v2136_v10 = vmov 0   ;;  %v2137_v6 = vmov 0.0   ;;  %v1451_v1 = vld [vmem:[%s3008_s5 + $0x70] sm:$0xff]  ;;  %vm2138_vm5 = vmmov 0  }
 0x41d   : > { %2026 = vset.pattern.permute.xlu0 %v2136_v10  ;;  %v1427_v50 = vmax.f32 %v1426_v28, 1.0  ;;  %1819 = vmatprep.subr.mxu0 %v2137_v6  ;;  %v1450_v16 = vld [vmem:[%s3008_s5 + $0x68] sm:$0xff]  ;;  %v1449_v41 = vld [vmem:[%s3008_s5 + $0x60] sm:$0xff]  ;;  %v1448_v52 = vld [vmem:[%s3008_s5 + $0x58] sm:$0xff]  ;;  %vm1530_vm6 = vcmask 261120  }
 0x41e   : > { %1820 = vmatpush3.msra.mxu0 %v1452_v44  ;;  %v1447_v48 = vld [vmem:[%s3008_s5 + $0x50] sm:$0xff]  ;;  %v1446_v42 = vld [vmem:[%s3008_s5 + $0x48] sm:$0xff]  ;;  %v1445_v49 = vld [vmem:[%s3008_s5 + $0x40] sm:$0xff]  ;;  %1851 = vmatprep.mubr.msk.f32.mxu0 %vm2138_vm5, %v2137_v6 }
 0x41f   : > { %2027 = vrcp.f32 %v1427_v50  ;;  %1821 = vmatprep.subr.mxu0 %v2137_v6  ;;  %v1444_v53 = vld [vmem:[%s3008_s5 + $0x38] sm:$0xff]  ;;  %v1443_v43 = vld [vmem:[%s3008_s5 + $0x30] sm:$0xff]  ;;  %v1442_v7 = vld [vmem:[%s3008_s5 + $0x28] sm:$0xff] }
 0x420   : > { %1822 = vmatpush3.msra.mxu0 %v1451_v1  ;;  %v1441_v40 = vld [vmem:[%s3008_s5 + $0x20] sm:$0xff]  ;;  %v1440_v57 = vld [vmem:[%s3008_s5 + $0x18] sm:$0xff]  ;;  %v1439_v56 = vld [vmem:[%s3008_s5 + $0x10] sm:$0xff] }
 0x421   : > { %1823 = vmatprep.subr.mxu0 %v2137_v6  ;;  %v1438_v14 = vld [vmem:[%s3008_s5 + $0x8] sm:$0xff]  ;;  %v1437_v54 = vld [vmem:[%s3008_s5] sm:$0xff] }
 0x422   : > { %1824 = vmatpush3.msra.mxu0 %v1450_v16  ;;  %v1430_v33 = vld [vmem:[#allocation2] sm:$0xff] }
 0x423   : > { %1825 = vmatprep.subr.mxu0 %v2137_v6  ;;  %v1677_v35 = vld [vmem:[%s3009_s6] ss:$0 sm:$0xff] }
 0x424   : > { %1826 = vmatpush3.msra.mxu0 %v1449_v41  ;;  %v1678_v21 = vld [vmem:[%s3010_s7] ss:$0 sm:$0xff] }
 0x425   : > { %1827 = vmatprep.subr.mxu0 %v2137_v6  ;;  %v1679_v63 = vld [vmem:[%s3011_s8] ss:$0 sm:$0xff] }
 0x426   : > { %1828 = vmatpush3.msra.mxu0 %v1448_v52 }
 0x427   : > { %1829 = vmatprep.subr.mxu0 %v2137_v6 }
 0x428   : > { %1830 = vmatpush3.msra.mxu0 %v1447_v48 }
 0x429   : > { %1831 = vmatprep.subr.mxu0 %v2137_v6 }
 0x42a   : > { %1832 = vmatpush3.msra.mxu0 %v1446_v42 }
 0x42b   : > { %1833 = vmatprep.subr.mxu0 %v2137_v6 }
 0x42c   : > { %v2028_v55 = vpop.eup %2027  ;;  %1834 = vmatpush3.msra.mxu0 %v1445_v49 }
 0x42d   : > { %1433 = vperm.xlu0 %2026, %v2028_v55   ;;  %1835 = vmatprep.subr.mxu0 %v2137_v6 }
 0x42e   : > { %1836 = vmatpush3.msra.mxu0 %v1444_v53 }
 0x42f   : > { %1837 = vmatprep.subr.mxu0 %v2137_v6 }
 0x430   : > { %1838 = vmatpush3.msra.mxu0 %v1443_v43 }
 0x431   : > { %1839 = vmatprep.subr.mxu0 %v2137_v6 }
 0x432   : > { %1840 = vmatpush3.msra.mxu0 %v1442_v7 }
 0x433   : > { %1841 = vmatprep.subr.mxu0 %v2137_v6 }
 0x434   : > { %1842 = vmatpush3.msra.mxu0 %v1441_v40 }
 0x435   : > { %1843 = vmatprep.subr.mxu0 %v2137_v6 }
 0x436   : > { %1844 = vmatpush3.msra.mxu0 %v1440_v57 }
 0x437   : > { %1845 = vmatprep.subr.mxu0 %v2137_v6 }
 0x438   : > { %1846 = vmatpush3.msra.mxu0 %v1439_v56 }
 0x439   : > { %1847 = vmatprep.subr.mxu0 %v2137_v6 }
 0x43a   : > { %1848 = vmatpush3.msra.mxu0 %v1438_v14 }
 0x43b   : > { %1849 = vmatprep.subr.mxu0 %v2137_v6 }
 0x43c   : > { %1850 = vmatpush3.msra.mxu0 %v1437_v54 }
 0x4a8   : > { %v1434_v45 = vpop.permute.xlu0 %1433 }
 0x4a9   : > { %v1436_v11 = vmul.f32 %v1434_v45, %v1430_v33 }
 0x4ab   : > { %1852 = vmatmul.mubr.f32.vlgmr.msra.gmra.mxu0 %v1436_v11 }
 0x56b   : > { %v1526_v59 = vpop.f32.mrf.mxu0 }
 0x56c   : > { %v1527_v29 = vadd.f32 %v1677_v35, %v1526_v59 }
 0x56d   : > { %v1853_v8 = vpop.f32.mrf.mxu0 }
 0x56e   : > { %v1531_v60 = vsel %vm1530_vm6, %v1527_v29, 0.0 }
 0x56f   : > { %1532 = vadd.xlane.f32.xlu0 %v1531_v60 }
 0x5f8   : > { %v1533_v61 = vpop.xlane.xlu0 %1532 }
 0x5f9   : > { %v1535_v13 = vmul.f32 0.03125, %v1533_v61 }
 0x5fb   : > { %v1536_v58 = vsub.f32 %v1527_v29, %v1535_v13 }
 0x5fd   : > { %v1537_v38 = vmul.f32 %v1536_v58, %v1536_v58 }
 0x5ff   : > { %v1538_v22 = vsel %vm1530_vm6, %v1537_v38, 0.0 }
 0x600   : > { %1539 = vadd.xlane.f32.xlu1 %v1538_v22 }
 0x689   : > { %v1540_v2 = vpop.xlane.xlu1 %1539 }
 0x68a   : > { %v1541_v51 = vmul.f32 0.03125, %v1540_v2 }
 0x68c   : > { %v1542_v5 = vadd.f32 1e-05, %v1541_v51 }
 0x68e   : > { %2029 = vrsqrt.f32 %v1542_v5 }
 0x69b   : > { %v2030_v17 = vpop.eup %2029 }
 0x69c   : > { %v1544_v24 = vmul.f32 %v2030_v17, %v1536_v58 }
 0x69e   : > { %v1552_v30 = vmul.f32 %v1678_v21, %v1544_v24 }
 0x6a0   : > { %v1560_v3 = vadd.f32 %v1679_v63, %v1552_v30 }
 0x6a2   : > { %v1680_v23 = vmul.f32 -1.442695, %v1560_v3 }
 0x6a4   : > { %2031 = vpow2.f32 %v1680_v23 }
 0x6b1   : > { %v2032_v62 = vpop.eup %2031 }
 0x6b2   : > { %v1564_v26 = vadd.f32 1.0, %v2032_v62 }
 0x6b4   : > { %2033 = vrcp.f32 %v1564_v26 }
 0x6c1   : > { %v2034_v39 = vpop.eup %2033 }
 0x6c2   : > { %v1567_v32 = vmul.f32 %v2034_v39, %v1560_v3 }
 0x6c4   : > { %1568 = vst.msk [vmem:[%s349_s14] sm:$0xff] %vm1530_vm6, %v1567_v32 }
 0x6c5 PF: > { %s1682_s27 = sshll.u32 %s2115_s13, 7  ;;  %s1583_s18 = sshll.u32 %s349_s14, 4  ;;  %s1584_s18 = int_to_ptr.vmem [resolvable:$true] %s1583_s18 }
 0x6c6   : > { %s1581_s29 = scalar_lea.hbm %s3012_s9, %s1682_s27  ;;  %s1570_s23 = scalar_lea.sflag [#allocation5], %s347_s26 }
 0x6c7   : > { %s2035_s19 = scalar_lea.vmem %s1584_s18, 128  ;;  %s2139_s12 = smov [#allocation4]  }
 0x6c8   : > { %p2036_p2 = scmp.ne.s32.totalorder %s1584_s18, %s2035_s19  ;;  %s2039_s20 = sshll.u32 %s2139_s12, 4  ;;  %s2040_s20 = int_to_ptr.vmem [resolvable:$false] %s2039_s20 }
 0x6c9   : > { %s2041_s24 = scalar_lea.vmem %s2040_s20, 256  ;;  %p2042_p6 = scmp.lt.s32.totalorder %s1584_s18, %s2040_s20 }
 0x6ca   : > { %p2037_p4 = pnand %p2036_p2, %p2239_p3  ;;  %p2043_p7 = scmp.lt.s32.totalorder %s2041_s24, %s2035_s19 }
 0x6cc   : > { %p2038_p5 = pneg %p2037_p4  ;;  %p2044_p8 = por %p2043_p7, %p2042_p6 }
 0x6ce   : > { %p2045_p10 = pnand %p2044_p8, %p2038_p5 }
 0x6d0   : > { %2048 = shalt.err (!%p2045_p10)
}
 0x6d1   : > { %s2049_s13 = scalar_lea.hbm %s1581_s29, 128  ;;  %s2053_s28 = scalar_lea.hbm %s3012_s9, 256 }
 0x6d2   : > { %p2050_p11 = scmp.ne.s32.totalorder %s1581_s29, %s2049_s13  ;;  %p2054_p0 = scmp.lt.s32.totalorder %s1581_s29, %s3012_s9 }
 0x6d3   : > { %p2055_p1 = scmp.lt.s32.totalorder %s2053_s28, %s2049_s13 }
 0x6d4   : > { %p2051_p12 = pnand %p2050_p11, %p2239_p3 }
 0x6d5   : > { %p2056_p2 = por %p2055_p1, %p2054_p0 }
 0x6d6   : > { %p2052_p13 = pneg %p2051_p12 }
 0x6d8   : > { %p2057_p4 = pnand %p2056_p2, %p2052_p13 }
 0x6da   : > { %2060 = shalt.err (!%p2057_p4)
}
 0x6db   : > { %1854 = dma.vmem_to_hbm [thread:$0]  (%p2239_p3), %s1584_s18, 128, %s1581_s29, %s1570_s23  }
 0x6dc PF: > { %p1860_p5 = scmp.ge.s32.totalorder %s2127_s16, 2  ;;  %s1595_s15 = sand.u32 1, %s2099_s30  }
 0x6dd   : > { %s1596_s19 = scalar_lea.sflag [#allocation5], %s1595_s15 }
 0x6de   : > { %p1857_p6 = pnand %p1860_p5, %p2249_p9 }
 0x6e0   : > { %p1858_p7 = pneg %p1857_p6 }
 0x6e2   : > { %2094 = dma.done.wait (%p1858_p7), %s1596_s19, 128  }
 0x6e3   : > { %2096 = vsyncadd (%p1858_p7), %s1596_s19, 4294967168  ;;  %s22_s16 = sadd.s32 1, %s2127_s16   ;;  %s3022_s12 = sld [smem:[#allocation7_spill]] }
 0x6e4   : > { %p19_p8 = scmp.ge.s32.totalorder %s22_s16, 8   ;;  %s3023_s13 = sld [smem:[#allocation8_spill]] }
 0x6e5   : > { %s3024_s14 = sld [smem:[#allocation9_spill]]  ;;  %s3026_s30 = smov %s2103_s10 }
 0x6e6   : > { %s3025_s15 = sld [smem:[#allocation10_spill]]  ;;  %s3027_s10 = smov %s2107_s11 }
 0x6e7   : > { %s3028_s11 = smov %s2257_s25  ;;  %21 = sbr.rel (!%p19_p8) target bundleno = 5 (0x5), region = 102 }
 0x6ec   :  { %1601 = vsyncpa [#allocation5], 1 }
 0x6ed   :  { %1603 = vsyncpa [#allocation5 + $0x1], 1 }

</bundles_post_ra>
